<compile_context>
chip_gen: v7x
topology: tpu7x:2x2x1
jax: 0.10.0
libtpu: 0.0.40
codegen_flags: <defaults>
</compile_context>

<pallas_src>
import jax
import jax.numpy as jnp
from jax.experimental import pallas as pl
from jax.experimental.pallas import tpu as pltpu


def _round_up(x, m):
    return (x + m - 1) // m * m


def _cdiv(a, b):
    return -(-a // b)


def _ff_kernel(x_ref, w1_ref, b1_ref, w2_ref, b2_ref, o_ref):
    # x_ref: [TM, Dp] f32 | w1_ref: [Dp, Hp] bf16 | b1_ref: [1, Hp] f32
    # w2_ref: [Hp, TN] bf16 | b2_ref: [1, TN] f32 | o_ref: [TM, TN]
    x = x_ref[...].astype(jnp.bfloat16)                       # in-kernel cast (VPU)
    h = jnp.dot(x, w1_ref[...], preferred_element_type=jnp.float32)
    h = jnp.tanh(h + b1_ref[...])                             # f32 bias + tanh (EUP)
    out = jnp.dot(h.astype(jnp.bfloat16), w2_ref[...],
                  preferred_element_type=jnp.float32) + b2_ref[...]
    o_ref[...] = out.astype(o_ref.dtype)


def prepare_feedforward_params(w1, b1, w2, b2):
    """One-time preprocessing: bf16 cast + zero-pad to (8,128)-friendly sizes.

    Zero padding is mathematically exact: padded hidden units produce tanh(0)=0
    activations that multiply zero rows of w2; padded feature columns are sliced off.
    Weights are stored [in, out] (transposed vs PyTorch's [out, in]).
    """
    D, H = w1.shape
    Dp = _round_up(D, 128)
    Hp = _round_up(H, 128)
    w1_p = jnp.zeros((Dp, Hp), jnp.bfloat16).at[:D, :H].set(w1.astype(jnp.bfloat16))
    b1_p = jnp.zeros((1, Hp), jnp.float32).at[0, :H].set(b1.astype(jnp.float32))
    w2_p = jnp.zeros((Hp, Dp), jnp.bfloat16).at[:H, :D].set(w2.astype(jnp.bfloat16))
    b2_p = jnp.zeros((1, Dp), jnp.float32).at[0, :D].set(b2.astype(jnp.float32))
    return dict(w1=w1_p, b1=b1_p, w2=w2_p, b2=b2_p, D=D, H=H, Dp=Dp, Hp=Hp)


def feedforward_pallas(x, params, *, tile_m=256, out_dtype=None):
    """x: [B, ...] float array with prod(x.shape[1:]) == params['D'].
    Returns same shape/dtype as x (PyTorch Feedforward semantics)."""
    shape = x.shape
    B = shape[0]
    D, H = params["D"], params["H"]
    Dp, Hp = params["Dp"], params["Hp"]
    w1_p, b1_p, w2_p, b2_p = params["w1"], params["b1"], params["w2"], params["b2"]
    out_dtype = jnp.float32 if out_dtype is None else out_dtype
    out_bytes = jnp.dtype(out_dtype).itemsize

    # --- batch tiling: avoid a mostly-padded last tile -----------------------
    nb = max(1, _cdiv(B, tile_m))
    TM = _round_up(_cdiv(B, nb), 8)
    Bp = nb * TM

    # --- fc2 output-column tiling: only when the batch axis gives one tile ---
    TN = Dp
    if nb < 2:
        for cand in (Dp // 2, Dp // 4):
            if cand >= 256 and cand % 256 == 0 and Dp % cand == 0:
                TN = cand
                break
    nc = Dp // TN

    # --- flatten x; keep f32; pad only when actually needed ------------------
    x_flat = x.reshape(B, D).astype(jnp.float32)
    if B == Bp and D == Dp:
        x_in = x_flat                               # zero-copy path (aligned case)
    else:
        x_in = jnp.zeros((Bp, Dp), jnp.float32).at[:B, :D].set(x_flat)

    # --- VMEM budget ----------------------------------------------------------
    w_buf = 1          # resident operands single-buffered (best case)
    w2_buf = 1 if nc == 1 else 2
    est_vmem = (2 * TM * Dp * 4              # x tile (f32), double-buffered
                + 2 * TM * TN * out_bytes    # out tile, double-buffered
                + w_buf * Dp * Hp * 2        # w1 (bf16)
                + w2_buf * Hp * TN * 2       # w2 (bf16)
                + w_buf * 8 * Hp * 4         # b1 (sublane-padded)
                + w2_buf * 8 * TN * 4)       # b2 (sublane-padded)
    try:
        vmem_cap = int(pltpu.get_tpu_info().vmem_capacity_bytes)
    except Exception:
        vmem_cap = 64 << 20                  # conservative (v7x) fallback
    vmem_limit = int(min(vmem_cap * 3 // 4, max(2 * est_vmem, 16 << 20)))

    cost = pl.CostEstimate(
        flops=2 * Bp * Dp * Hp * (nc + 1),          # fc1 (recomputed per col tile) + fc2
        transcendentals=nc * Bp * Hp,               # tanh
        bytes_accessed=(Bp * Dp * 4                  # x read
                        + w1_p.size * 2 + w2_p.size * 2
                        + b1_p.size * 4 + b2_p.size * 4
                        + Bp * Dp * out_bytes),      # out write
    )

    def build_specs(single_buffer):
        def spec(block_shape, index_map, resident):
            if resident and single_buffer and hasattr(pl, "Buffered"):
                try:
                    return pl.BlockSpec(block_shape, index_map,
                                        pipeline_mode=pl.Buffered(1))
                except TypeError:
                    pass
            return pl.BlockSpec(block_shape, index_map)

        in_specs = [
            spec((TM, Dp), lambda i, j: (i, 0), resident=False),       # x tile
            spec((Dp, Hp), lambda i, j: (0, 0), resident=True),        # w1 resident
            spec((1, Hp), lambda i, j: (0, 0), resident=True),         # b1 resident
            spec((Hp, TN), lambda i, j: (0, j), resident=(nc == 1)),   # w2 (col tiled)
            spec((1, TN), lambda i, j: (0, j), resident=(nc == 1)),    # b2 (col tiled)
        ]
        out_spec = spec((TM, TN), lambda i, j: (i, j), resident=False)
        return in_specs, out_spec

    def run(single_buffer):
        in_specs, out_spec = build_specs(single_buffer)
        return pl.pallas_call(
            _ff_kernel,
            out_shape=jax.ShapeDtypeStruct((Bp, Dp), out_dtype),
            grid_spec=pltpu.PrefetchScalarGridSpec(
                num_scalar_prefetch=0,
                grid=(nb, nc),
                in_specs=in_specs,
                out_specs=out_spec,
            ),
            compiler_params=pltpu.CompilerParams(
                dimension_semantics=("parallel", "parallel"),
                vmem_limit_bytes=vmem_limit,
            ),
            cost_estimate=cost,
        )(x_in, w1_p, b1_p, w2_p, b2_p)

    try:
        out_p = run(single_buffer=True)      # resident weights single-buffered
    except Exception:
        out_p = run(single_buffer=False)     # graceful fallback: default buffering

    return out_p[:B, :D].reshape(shape).astype(x.dtype)


def init_params(key, input_dim, hidden_dim, dtype=jnp.float32):
    """Deterministic init mimicking nn.Linear defaults (uniform +/- 1/sqrt(fan_in)).
    Weights stored as [in, out] (transposed relative to PyTorch's [out, in])."""
    k1, k2, k3, k4 = jax.random.split(key, 4)
    bound1 = 1.0 / (input_dim ** 0.5)
    bound2 = 1.0 / (hidden_dim ** 0.5)
    w1 = jax.random.uniform(k1, (input_dim, hidden_dim), dtype, -bound1, bound1)
    b1 = jax.random.uniform(k2, (hidden_dim,), dtype, -bound1, bound1)
    w2 = jax.random.uniform(k3, (hidden_dim, input_dim), dtype, -bound2, bound2)
    b2 = jax.random.uniform(k4, (input_dim,), dtype, -bound2, bound2)
    return w1, b1, w2, b2


def feedforward_ref_f32(x, w1, b1, w2, b2):
    shape = x.shape
    xf = x.reshape(shape[0], -1)
    h = jnp.tanh(xf @ w1 + b1)
    out = h @ w2 + b2
    return out.reshape(shape)


def feedforward_ref_bf16(x, w1, b1, w2, b2):
    """Mirrors the kernel's bf16-input / f32-accumulate arithmetic."""
    shape = x.shape
    xf = x.reshape(shape[0], -1).astype(jnp.bfloat16).astype(jnp.float32)
    w1b = w1.astype(jnp.bfloat16).astype(jnp.float32)
    w2b = w2.astype(jnp.bfloat16).astype(jnp.float32)
    h = jnp.tanh(xf @ w1b + b1)
    h = h.astype(jnp.bfloat16).astype(jnp.float32)
    out = h @ w2b + b2
    return out.reshape(shape)


if __name__ == "__main__":
    key = jax.random.PRNGKey(0)
    kx, kp = jax.random.split(key)

    # Small shapes: batch=2, channels=4, spatial=16x16 -> input_dim=1024, hidden_dim=32
    B, C, Hs, Ws = 2, 4, 16, 16
    input_dim = C * Hs * Ws
    hidden_dim = 32

    x = jax.random.normal(kx, (B, C, Hs, Ws), dtype=jnp.float32)
    w1, b1, w2, b2 = init_params(kp, input_dim, hidden_dim)

    # Preprocess weights ONCE; reuse the padded bf16 copies across every forward call.
    params = prepare_feedforward_params(w1, b1, w2, b2)

    out = feedforward_pallas(x, params)
    jax.block_until_ready(out)

    assert out.shape == x.shape
    ref_bf16 = feedforward_ref_bf16(x, w1, b1, w2, b2)   # same arithmetic as kernel
    ref_f32 = feedforward_ref_f32(x, w1, b1, w2, b2)     # pure-f32 reference
    assert jnp.allclose(out, ref_bf16, atol=2e-2, rtol=2e-2)
    assert jnp.allclose(out, ref_f32, atol=5e-2, rtol=5e-2)

    print("KERNEL_OK")
</pallas_src>

<mosaic_0001>
module attributes {stable_mosaic.version = 11 : i64} {
  func.func @_ff_kernel(%arg0: i32, %arg1: i32, %arg2: memref<8x1024xf32, #tpu.memory_space<vmem>>, %arg3: memref<1024x128xbf16, #tpu.memory_space<vmem>>, %arg4: memref<1x128xf32, #tpu.memory_space<vmem>>, %arg5: memref<128x512xbf16, #tpu.memory_space<vmem>>, %arg6: memref<1x512xf32, #tpu.memory_space<vmem>>, %arg7: memref<8x512xf32, #tpu.memory_space<vmem>>) attributes {dimension_semantics = [#tpu.dimension_semantics<parallel>, #tpu.dimension_semantics<parallel>], iteration_bounds = array<i64: 1, 2>, scalar_prefetch = 0 : i64, scratch_operands = 0 : i64, tpu.core_type = #tpu.core_type<tc>, window_params = [{transform_indices = @transform_0, window_bounds = array<i64: 8, 1024>}, {pipeline_mode = #tpu.pipeline_mode<synchronous>, transform_indices = @transform_1, window_bounds = array<i64: 1024, 128>}, {pipeline_mode = #tpu.pipeline_mode<synchronous>, transform_indices = @transform_2, window_bounds = array<i64: 1, 128>}, {transform_indices = @transform_3, window_bounds = array<i64: 128, 512>}, {transform_indices = @transform_4, window_bounds = array<i64: 1, 512>}, {transform_indices = @transform_5, window_bounds = array<i64: 8, 512>}]} {
    %c0 = arith.constant 0 : index
    %c0_0 = arith.constant 0 : index
    %0 = vector.load %arg2[%c0, %c0_0] : memref<8x1024xf32, #tpu.memory_space<vmem>>, vector<8x1024xf32>
    %1 = arith.truncf %0 : vector<8x1024xf32> to vector<8x1024xbf16>
    %c0_1 = arith.constant 0 : index
    %c0_2 = arith.constant 0 : index
    %2 = vector.load %arg3[%c0_1, %c0_2] : memref<1024x128xbf16, #tpu.memory_space<vmem>>, vector<1024x128xbf16>
    %cst = arith.constant dense<0.000000e+00> : vector<8x128xf32>
    %3 = tpu.matmul %1, %2, %cst {dimension_numbers = #tpu.dot_dimension_numbers<[1], [0], [0], [1], [0, 0, 1, 1], [], []>} : vector<8x1024xbf16>, vector<1024x128xbf16>, vector<8x128xf32> -> vector<8x128xf32>
    %c0_3 = arith.constant 0 : index
    %c0_4 = arith.constant 0 : index
    %4 = vector.load %arg4[%c0_3, %c0_4] : memref<1x128xf32, #tpu.memory_space<vmem>>, vector<1x128xf32>
    %5 = vector.broadcast %4 : vector<1x128xf32> to vector<8x128xf32>
    %6 = arith.addf %3, %5 : vector<8x128xf32>
    %7 = math.tanh %6 : vector<8x128xf32>
    %8 = arith.truncf %7 : vector<8x128xf32> to vector<8x128xbf16>
    %c0_5 = arith.constant 0 : index
    %c0_6 = arith.constant 0 : index
    %9 = vector.load %arg5[%c0_5, %c0_6] : memref<128x512xbf16, #tpu.memory_space<vmem>>, vector<128x512xbf16>
    %cst_7 = arith.constant dense<0.000000e+00> : vector<8x512xf32>
    %10 = tpu.matmul %8, %9, %cst_7 {dimension_numbers = #tpu.dot_dimension_numbers<[1], [0], [0], [1], [0, 0, 1, 1], [], []>} : vector<8x128xbf16>, vector<128x512xbf16>, vector<8x512xf32> -> vector<8x512xf32>
    %c0_8 = arith.constant 0 : index
    %c0_9 = arith.constant 0 : index
    %11 = vector.load %arg6[%c0_8, %c0_9] : memref<1x512xf32, #tpu.memory_space<vmem>>, vector<1x512xf32>
    %12 = vector.broadcast %11 : vector<1x512xf32> to vector<8x512xf32>
    %13 = arith.addf %10, %12 : vector<8x512xf32>
    %c0_10 = arith.constant 0 : index
    %c0_11 = arith.constant 0 : index
    %14 = vector.load %arg7[%c0_10, %c0_11] : memref<8x512xf32, #tpu.memory_space<vmem>>, vector<8x512xf32>
    tpu.vector_store %arg7[%c0_10, %c0_11], %13 {strides = array<i32>} : memref<8x512xf32, #tpu.memory_space<vmem>>, vector<8x512xf32>,
    return
  }
  func.func @transform_0(%arg0: i32, %arg1: i32) -> (i32, i32) {
    %c0_i32 = arith.constant 0 : i32
    %c0_i32_0 = arith.constant 0 : i32
    return %arg0, %c0_i32 : i32, i32
  }
  func.func @transform_1(%arg0: i32, %arg1: i32) -> (i32, i32) {
    %c0_i32 = arith.constant 0 : i32
    %c0_i32_0 = arith.constant 0 : i32
    %c0_i32_1 = arith.constant 0 : i32
    return %c0_i32, %c0_i32_0 : i32, i32
  }
  func.func @transform_2(%arg0: i32, %arg1: i32) -> (i32, i32) {
    %c0_i32 = arith.constant 0 : i32
    %c0_i32_0 = arith.constant 0 : i32
    %c0_i32_1 = arith.constant 0 : i32
    return %c0_i32, %c0_i32_0 : i32, i32
  }
  func.func @transform_3(%arg0: i32, %arg1: i32) -> (i32, i32) {
    %c0_i32 = arith.constant 0 : i32
    %c0_i32_0 = arith.constant 0 : i32
    return %c0_i32, %arg1 : i32, i32
  }
  func.func @transform_4(%arg0: i32, %arg1: i32) -> (i32, i32) {
    %c0_i32 = arith.constant 0 : i32
    %c0_i32_0 = arith.constant 0 : i32
    return %c0_i32, %arg1 : i32, i32
  }
  func.func @transform_5(%arg0: i32, %arg1: i32) -> (i32, i32) {
    %c0_i32 = arith.constant 0 : i32
    return %arg0, %arg1 : i32, i32
  }
}

module attributes {stable_mosaic.version = 11 : i64} {
  func.func @_ff_kernel(%arg0: i32, %arg1: i32, %arg2: memref<8x1024xf32, #tpu.memory_space<vmem>>, %arg3: memref<1024x128xbf16, #tpu.memory_space<vmem>>, %arg4: memref<1x128xf32, #tpu.memory_space<vmem>>, %arg5: memref<128x512xbf16, #tpu.memory_space<vmem>>, %arg6: memref<1x512xf32, #tpu.memory_space<vmem>>, %arg7: memref<8x512xf32, #tpu.memory_space<vmem>>) attributes {dimension_semantics = [#tpu.dimension_semantics<parallel>, #tpu.dimension_semantics<parallel>], iteration_bounds = array<i64: 1, 2>, scalar_prefetch = 0 : i64, scratch_operands = 0 : i64, tpu.core_type = #tpu.core_type<tc>, window_params = [{transform_indices = @transform_0, window_bounds = array<i64: 8, 1024>}, {pipeline_mode = #tpu.pipeline_mode<synchronous>, transform_indices = @transform_1, window_bounds = array<i64: 1024, 128>}, {pipeline_mode = #tpu.pipeline_mode<synchronous>, transform_indices = @transform_2, window_bounds = array<i64: 1, 128>}, {transform_indices = @transform_3, window_bounds = array<i64: 128, 512>}, {transform_indices = @transform_4, window_bounds = array<i64: 1, 512>}, {transform_indices = @transform_5, window_bounds = array<i64: 8, 512>}]} {
    %c0 = arith.constant 0 : index
    %c0_0 = arith.constant 0 : index
    %0 = vector.load %arg2[%c0, %c0_0] : memref<8x1024xf32, #tpu.memory_space<vmem>>, vector<8x1024xf32>
    %1 = arith.truncf %0 : vector<8x1024xf32> to vector<8x1024xbf16>
    %c0_1 = arith.constant 0 : index
    %c0_2 = arith.constant 0 : index
    %2 = vector.load %arg3[%c0_1, %c0_2] : memref<1024x128xbf16, #tpu.memory_space<vmem>>, vector<1024x128xbf16>
    %cst = arith.constant dense<0.000000e+00> : vector<8x128xf32>
    %3 = tpu.matmul %1, %2, %cst {dimension_numbers = #tpu.dot_dimension_numbers<[1], [0], [0], [1], [0, 0, 1, 1], [], []>} : vector<8x1024xbf16>, vector<1024x128xbf16>, vector<8x128xf32> -> vector<8x128xf32>
    %c0_3 = arith.constant 0 : index
    %c0_4 = arith.constant 0 : index
    %4 = vector.load %arg4[%c0_3, %c0_4] : memref<1x128xf32, #tpu.memory_space<vmem>>, vector<1x128xf32>
    %5 = vector.broadcast %4 : vector<1x128xf32> to vector<8x128xf32>
    %6 = arith.addf %3, %5 : vector<8x128xf32>
    %7 = math.tanh %6 : vector<8x128xf32>
    %8 = arith.truncf %7 : vector<8x128xf32> to vector<8x128xbf16>
    %c0_5 = arith.constant 0 : index
    %c0_6 = arith.constant 0 : index
    %9 = vector.load %arg5[%c0_5, %c0_6] : memref<128x512xbf16, #tpu.memory_space<vmem>>, vector<128x512xbf16>
    %cst_7 = arith.constant dense<0.000000e+00> : vector<8x512xf32>
    %10 = tpu.matmul %8, %9, %cst_7 {dimension_numbers = #tpu.dot_dimension_numbers<[1], [0], [0], [1], [0, 0, 1, 1], [], []>} : vector<8x128xbf16>, vector<128x512xbf16>, vector<8x512xf32> -> vector<8x512xf32>
    %c0_8 = arith.constant 0 : index
    %c0_9 = arith.constant 0 : index
    %11 = vector.load %arg6[%c0_8, %c0_9] : memref<1x512xf32, #tpu.memory_space<vmem>>, vector<1x512xf32>
    %12 = vector.broadcast %11 : vector<1x512xf32> to vector<8x512xf32>
    %13 = arith.addf %10, %12 : vector<8x512xf32>
    %c0_10 = arith.constant 0 : index
    %c0_11 = arith.constant 0 : index
    %14 = vector.load %arg7[%c0_10, %c0_11] : memref<8x512xf32, #tpu.memory_space<vmem>>, vector<8x512xf32>
    tpu.vector_store %arg7[%c0_10, %c0_11], %13 {strides = array<i32>} : memref<8x512xf32, #tpu.memory_space<vmem>>, vector<8x512xf32>,
    return
  }
  func.func @transform_0(%arg0: i32, %arg1: i32) -> (i32, i32) {
    %c0_i32 = arith.constant 0 : i32
    %c0_i32_0 = arith.constant 0 : i32
    return %arg0, %c0_i32 : i32, i32
  }
  func.func @transform_1(%arg0: i32, %arg1: i32) -> (i32, i32) {
    %c0_i32 = arith.constant 0 : i32
    %c0_i32_0 = arith.constant 0 : i32
    %c0_i32_1 = arith.constant 0 : i32
    return %c0_i32, %c0_i32_0 : i32, i32
  }
  func.func @transform_2(%arg0: i32, %arg1: i32) -> (i32, i32) {
    %c0_i32 = arith.constant 0 : i32
    %c0_i32_0 = arith.constant 0 : i32
    %c0_i32_1 = arith.constant 0 : i32
    return %c0_i32, %c0_i32_0 : i32, i32
  }
  func.func @transform_3(%arg0: i32, %arg1: i32) -> (i32, i32) {
    %c0_i32 = arith.constant 0 : i32
    %c0_i32_0 = arith.constant 0 : i32
    return %c0_i32, %arg1 : i32, i32
  }
  func.func @transform_4(%arg0: i32, %arg1: i32) -> (i32, i32) {
    %c0_i32 = arith.constant 0 : i32
    %c0_i32_0 = arith.constant 0 : i32
    return %c0_i32, %arg1 : i32, i32
  }
  func.func @transform_5(%arg0: i32, %arg1: i32) -> (i32, i32) {
    %c0_i32 = arith.constant 0 : i32
    return %arg0, %arg1 : i32, i32
  }
}

</mosaic_0001>

<bundles_post_ra>
// kernel: tpu_custom_call.1
= control target key start
LH: loop header
LB: loop body
LE: loop exit
PB: predicated region body
PF: predicated region fallthrough
CT: control target
= control target key end

     0   :  { %s2358_s0 = inlined_call_operand.hbm [shape: f32[8,1024], index: 0, kind: input, shape index: {}]   ;;  %s2359_s1 = inlined_call_operand.hbm [shape: bf16[1024,128], index: 1, kind: input, shape index: {}]   ;;  %s2360_s2 = inlined_call_operand.vmem [shape: f32[1,128], index: 2, kind: input, shape index: {}]   ;;  %s2361_s3 = inlined_call_operand.hbm [shape: bf16[128,1024], index: 3, kind: input, shape index: {}]   ;;  %s2362_s4 = inlined_call_operand.vmem [shape: f32[1,1024], index: 4, kind: input, shape index: {}]   ;;  %s2363_s5 = inlined_call_operand.hbm [shape: f32[8,1024], index: 5, kind: output, shape index: {}]  }
   0x1   :  { %2369 = sst [smem:[#allocation13_spill]] %s2358_s0 }
   0x2   :  { %10 = vsyncpa [#allocation3], 0 }
   0x3   :  { %11 = vsyncpa [#allocation6], 0 }
   0x4   :  { %12 = vsyncpa [#allocation4], 0 }
   0x5   :  { %14 = vsyncpa [#allocation4 + $0x1], 0  ;;  %s2065_s18 = smov 0   ;;  %s2067_s19 = smov 0  }
   0x6   :  { %s2069_s20 = smov 0   ;;  %s2071_s21 = smov 0  }
   0x7   :  { %s2073_s22 = smov 0   ;;  %s2075_s23 = smov 0  }
   0x8 LB: > { %s2096_s24 = sadd.s32 4294967295, %s2023_s23   ;;  %s1438_s25 = sadd.s32 4294967294, %s2023_s23   ;;  %s2023_s23 = sphi %s2075_s23, %s20_s23   ;;  %s2019_s22 = sphi %s2073_s22, %s2393_s22   ;;  %s2015_s21 = sphi %s2071_s21, %s2392_s21   ;;  %s2011_s20 = sphi %s2069_s20, %s2391_s20   ;;  %s2007_s19 = sphi %s2067_s19, %s2390_s19   ;;  %s2003_s18 = sphi %s2065_s18, %s2389_s18  }
   0x9   : > { %p114_p0 = scmp.ne.s32.totalorder %s2011_s20, %s2007_s19  ;;  %p115_p1 = scmp.eq.s32.totalorder %s2023_s23, 0 }
   0xa   : > { %p120_p2 = scmp.ne.s32.totalorder %s2007_s19, %s2003_s18  ;;  %p2364_p3 = scmp.eq.s32.totalorder %s2096_s24, 0 }
   0xb   : > { %p172_p4 = scmp.eq.s32.totalorder %s2096_s24, 1  ;;  %p2107_p5 = por %p115_p1, %p114_p0 }
   0xc   : > { %p178_p6 = scmp.eq.s32.totalorder %s1438_s25, 1  ;;  %p2113_p7 = por %p2364_p3, %p120_p2 }
   0xd   : > { %p2117_p8 = por %p172_p4, %p114_p0  ;;  %p1439_p10 = scmp.ge.s32.totalorder %s2023_s23, 1 }
   0xe   : > { %s2371_s28 = scalar_select %p2113_p7, 1, 0 }
   0xf   : > { %s2372_s29 = scalar_select %p2117_p8, 1, 0 }
  0x10   : > { %p2121_p9 = por %p178_p6, %p120_p2  ;;  %p185_p11 = scmp.lt.s32.totalorder %s2023_s23, 3 }
  0x11   : > { %s2025_s7 = smov [#allocation2]   ;;  %p1673_p1 = scmp.lt.s32.totalorder %s2023_s23, 2 }
  0x12   : > { %s2373_s30 = scalar_select %p2121_p9, 1, 0 }
  0x13   : > { %p2128_p13 = pnand %p1439_p10, %p185_p11  ;;  %s201_s8 = sshll.u32 %s2025_s7, 4  ;;  %s202_s8 = int_to_ptr.vmem [resolvable:$true] %s201_s8 }
  0x14   : > { %p2137_p4 = pnand %p1673_p1, %p2107_p5  ;;  %s2026_s10 = smov [#allocation5]  }
  0x15   : > { %s2374_s6 = scalar_select %p2128_p13, 1, 0 }
  0x16   : > { %p1656_p0 = pneg %p2128_p13  ;;  %s211_s11 = sshll.u32 %s2026_s10, 4  ;;  %s2147_s11 = int_to_ptr.vmem [resolvable:$true] %s211_s11 }
  0x17   : > { %s2375_s9 = scalar_select %p2137_p4, 1, 0 }
  0x18   : > { %p2143_p2 = pnand %p1656_p0, %p2364_p3  ;;  %s2377_s0 = sld [smem:[#allocation13_spill]] }
  0x1a   : > { %p1849_p6 = pneg %p2143_p2 }
  0x1e   : > { %s1847_s15 = scalar_lea.hbm %s2377_s0, 1024 }
  0x1f   : > { %p1848_p5 = scmp.ne.s32.totalorder %s2377_s0, %s1847_s15  ;;  %p1854_p1 = scmp.lt.u32.totalorder %s1847_s15, %s2377_s0 }
  0x21   : > { %p1850_p10 = pnand %p1849_p6, %p1848_p5 }
  0x23   : > { %p1851_p11 = pneg %p1850_p10 }
  0x25   : > { %p1856_p0 = pnand %p1854_p1, %p1851_p11 }
  0x27   : > { %1859 = shalt.err (!%p1856_p0)
}
  0x28   : > { %s1860_s7 = scalar_lea.vmem %s202_s8, 1024  ;;  %p1868_p8 = scmp.lt.s32.totalorder %s202_s8, %s202_s8 }
  0x29   : > { %p1861_p12 = scmp.ne.s32.totalorder %s202_s8, %s1860_s7  ;;  %p1869_p7 = scmp.lt.s32.totalorder %s1860_s7, %s1860_s7 }
  0x2b   : > { %p1863_p3 = pnand %p1861_p12, %p1849_p6  ;;  %p1870_p13 = por %p1869_p7, %p1868_p8 }
  0x2d   : > { %p1864_p9 = pneg %p1863_p3 }
  0x2f   : > { %p1871_p4 = pnand %p1870_p13, %p1864_p9 }
  0x31   : > { %1874 = shalt.err (!%p1871_p4)
}
  0x32   : > { %1659 = dma.hbm_to_vmem [thread:$0]  (!%p2143_p2), %s2377_s0, 1024, %s202_s8, [#allocation3]  }
  0x33   : > { %s1875_s16 = scalar_lea.hbm %s2359_s1, 8192 }
  0x34   : > { %p1876_p3 = scmp.ne.s32.totalorder %s2359_s1, %s1875_s16  ;;  %p1882_p9 = scmp.lt.u32.totalorder %s1875_s16, %s2359_s1 }
  0x36   : > { %p1878_p7 = pnand %p1876_p3, %p1849_p6 }
  0x38   : > { %p1879_p8 = pneg %p1878_p7 }
  0x3a   : > { %p1884_p12 = pnand %p1882_p9, %p1879_p8 }
  0x3c   : > { %1887 = shalt.err (!%p1884_p12)
}
  0x3d   : > { %s1888_s8 = scalar_lea.vmem %s2147_s11, 8192  ;;  %p1896_p10 = scmp.lt.s32.totalorder %s2147_s11, %s2147_s11 }
  0x3e   : > { %p1889_p13 = scmp.ne.s32.totalorder %s2147_s11, %s1888_s8  ;;  %p1897_p11 = scmp.lt.s32.totalorder %s1888_s8, %s1888_s8 }
  0x40   : > { %p1891_p4 = pnand %p1889_p13, %p1849_p6  ;;  %p1898_p1 = por %p1897_p11, %p1896_p10 }
  0x42   : > { %p1892_p5 = pneg %p1891_p4 }
  0x44   : > { %p1899_p0 = pnand %p1898_p1, %p1892_p5 }
  0x46   : > { %1902 = shalt.err (!%p1899_p0)
}
  0x47   : > { %s2027_s10 = smov 64   ;;  %s2028_s13 = smov 4  }
  0x48   : > { %1662 = dma.hbm_to_vmem [thread:$0]  (!%p2143_p2), %s2359_s1, 8192, %s2147_s11, [#allocation6], %s2027_s10, %s2027_s10, %s2028_s13  }
  0x49   : > { %s228_s16 = sand.u32 1, %s2023_s23   ;;  %s29_s17 = sadd.s32 1, %s2019_s22 }
  0x4a   : > { %s230_s25 = sand.u32 1, %s2011_s20   ;;  %p30_p6 = scmp.ge.s32.totalorder %s29_s17, 2 }
  0x4b   : > { %s1443_s27 = sshll.u32 %s230_s25, 8  ;;  %s1554_s7 = sshll.u32 %s2019_s22, 8 }
  0x4c   : > { %s2395_s17 = smov (%p30_p6, %s29_s17), 0  ;;  %s2205_s0 = scalar_lea.hbm %s2361_s3, %s1554_s7 }
  0x4d   : > { %s232_s11 = scalar_lea.vmem [#allocation7], %s1443_s27  ;;  %s104_s10 = ssub.s32 %s2019_s22, %s2395_s17 }
  0x4e   : > { %s239_s12 = sshll.u32 %s232_s11, 4  ;;  %p105_p2 = scmp.eq.s32.totalorder %s104_s10, 0  ;;  %s2209_s12 = int_to_ptr.vmem [resolvable:$true] %s239_s12 }
  0x4f   : > { %s2378_s13 = sadd.s32 1, %s2011_s20  ;;  %s2216_s15 = scalar_lea.sflag [#allocation3], %s228_s16 }
  0x50   : > { %s2214_s14 = scalar_select %p105_p2, %s2011_s20, %s2378_s13  }
  0x51   : > { %s1903_s25 = scalar_lea.hbm %s2205_s0, 4096  ;;  %p2379_p7 = scmp.ne.s32.totalorder %s2375_s9, 0 }
  0x52   : > { %p1904_p3 = scmp.ne.s32.totalorder %s2205_s0, %s1903_s25  ;;  %s1908_s7 = scalar_lea.hbm %s2361_s3, 8192 }
  0x53   : > { %p1905_p8 = pneg %p2379_p7  ;;  %p1909_p13 = scmp.lt.u32.totalorder %s2205_s0, %s2361_s3 }
  0x54   : > { %p1910_p4 = scmp.lt.u32.totalorder %s1908_s7, %s1903_s25  ;;  %p1912_p10 = scmp.lt.u32.totalorder %s1903_s25, %s2205_s0 }
  0x55   : > { %p1906_p9 = pnand %p1905_p8, %p1904_p3 }
  0x56   : > { %p1911_p5 = por %p1910_p4, %p1909_p13 }
  0x57   : > { %p1907_p12 = pneg %p1906_p9 }
  0x58   : > { %p1913_p11 = por %p1912_p10, %p1911_p5 }
  0x5a   : > { %p1914_p1 = pnand %p1913_p11, %p1907_p12 }
  0x5c   : > { %1917 = shalt.err (!%p1914_p1)
}
  0x5d   : > { %s1918_s16 = scalar_lea.vmem %s2209_s12, 4096  ;;  %s2029_s10 = smov [#allocation7]  }
  0x5e   : > { %p1919_p0 = scmp.ne.s32.totalorder %s2209_s12, %s1918_s16  ;;  %s1923_s13 = sshll.u32 %s2029_s10, 4  ;;  %s1924_s13 = int_to_ptr.vmem [resolvable:$false] %s1923_s13 }
  0x5f   : > { %s1925_s26 = scalar_lea.vmem %s1924_s13, 8192  ;;  %p1926_p3 = scmp.lt.s32.totalorder %s2209_s12, %s1924_s13 }
  0x60   : > { %p1921_p6 = pnand %p1919_p0, %p1905_p8  ;;  %p1927_p9 = scmp.lt.s32.totalorder %s1925_s26, %s1918_s16 }
  0x62   : > { %p1922_p2 = pneg %p1921_p6  ;;  %p1928_p13 = por %p1927_p9, %p1926_p3 }
  0x64   : > { %p1929_p4 = pnand %p1928_p13, %p1922_p2 }
  0x66   : > { %1932 = shalt.err (!%p1929_p4)
}
  0x67   : > { %s2030_s25 = smov 512   ;;  %s2031_s27 = smov 256  }
  0x68   : > { %s2032_s7 = smov 16   ;;  %p2380_p8 = scmp.ne.s32.totalorder %s2374_s6, 0 }
  0x69   : > { %1666 = dma.hbm_to_vmem [thread:$0]  (!%p2379_p7), %s2205_s0, 4096, %s2209_s12, %s2216_s15, %s2030_s25, %s2031_s27, %s2032_s7  }
  0x6a   : > { %259 = sbr.rel (%p2380_p8) target bundleno = 650 (0x28a), region = 40  ;;  %p2381_p12 = scmp.eq.s32.totalorder (!%p2380_p8), %s2096_s24, 0 }
  0x71   : > { %1986 = dma.done.wait (%p2381_p12), [#allocation3], 1024   ;;  %p2382_p5 = pmov %p2381_p12 }
  0x73   : > { %1988 = vsyncadd (%p2382_p5), [#allocation3], 4294966272  ;;  %p2383_p10 = pmov %p2382_p5 }
  0x74   : > { %p2384_p11 = pmov %p2382_p5 }
  0x75   : > { %1990 = dma.done.wait (%p2383_p10), [#allocation6], 8192  }
  0x76   : > { %1992 = vsyncadd (%p2384_p11), [#allocation6], 4294959104  ;;  %s269_s9 = sand.u32 1, %s2096_s24   ;;  %s2256_s0 = sand.u32 1, %s2007_s19  }
  0x77   : > { %s1449_s6 = sshll.u32 %s2256_s0, 8  ;;  %s270_s12 = scalar_lea.sflag [#allocation3], %s269_s9 }
  0x78   : > { %s2259_s15 = scalar_lea.vmem [#allocation7], %s1449_s6  ;;  %p2385_p7 = scmp.ne.s32.totalorder %s2371_s28, 0 }
  0x7a   : > { %1994 = dma.done.wait (%p2385_p7), %s270_s12, 4096  }
  0x7b   : > { %1996 = vsyncadd (%p2385_p7), %s270_s12, 4294963200  ;;  %v1733_v0 = vld [vmem:[#allocation5 + $0x40] sm:$0xff]   ;;  %v1737_v4 = vld [vmem:[#allocation5 + $0x48] sm:$0xff]   ;;  %s1451_s8 = sshll.u32 %s2015_s21, 2  ;;  %s1450_s13 = sshll.u32 %s2256_s0, 5 }
  0x7c   : > { %v1734_v1 = vld [vmem:[#allocation5 + $0xc0] sm:$0xff]   ;;  %1556 = vmatprep.subr.bf16.mxu0 %v1733_v0  ;;  %v1738_v5 = vld [vmem:[#allocation5 + $0xc8] sm:$0xff]   ;;  %v1741_v8 = vld [vmem:[#allocation5 + $0x50] sm:$0xff]   ;;  %p306_p1 = scmp.lt.s32.totalorder %s1451_s8, 7  ;;  %s1555_s26 = sshll.u32 %s2015_s21, 9 }
  0x7d   : > { %v1735_v2 = vld [vmem:[#allocation5] sm:$0xff]   ;;  %1578 = vmatprep.subr.bf16.mxu1 %v1734_v1  ;;  %v1739_v6 = vld [vmem:[#allocation5 + $0x8] sm:$0xff]   ;;  %v1742_v9 = vld [vmem:[#allocation5 + $0xd0] sm:$0xff]   ;;  %s303_s25 = scalar_lea.vmem [#allocation8], %s1450_s13  ;;  %s2309_s6 = scalar_lea.hbm %s2363_s5, %s1555_s26 }
  0x7e   : > { %v1736_v3 = vld [vmem:[#allocation5 + $0x80] sm:$0xff]   ;;  %1557 = vmatpush3.bf16.msra.mxu0 %v1735_v2  ;;  %v1740_v7 = vld [vmem:[#allocation5 + $0x88] sm:$0xff]   ;;  %v1743_v10 = vld [vmem:[#allocation5 + $0x10] sm:$0xff]   ;;  %s2397_s8 = smov (!%p306_p1, %s1451_s8), 7  ;;  %s1326_s27 = sshll.u32 %s303_s25, 4  ;;  %s2311_s27 = int_to_ptr.vmem [resolvable:$true] %s1326_s27 }
  0x7f   : > { %1579 = vmatpush3.bf16.msra.mxu1 %v1736_v3  ;;  %1558 = vmatprep.subr.bf16.mxu0 %v1737_v4  ;;  %v1744_v11 = vld [vmem:[#allocation5 + $0x90] sm:$0xff]   ;;  %v1745_v12 = vld [vmem:[#allocation5 + $0x58] sm:$0xff]   ;;  %v1749_v16 = vld [vmem:[#allocation5 + $0x60] sm:$0xff]   ;;  %s308_s10 = scalar_lea.vmem %s2362_s4, %s2397_s8  ;;  %s1310_s21 = scalar_lea.sflag [#allocation4], %s2256_s0 }
  0x80   : > { %1580 = vmatprep.subr.bf16.mxu1 %v1738_v5  ;;  %v1746_v13 = vld [vmem:[#allocation5 + $0xd8] sm:$0xff]   ;;  %v1750_v17 = vld [vmem:[#allocation5 + $0xe0] sm:$0xff]   ;;  %v1753_v20 = vld [vmem:[#allocation5 + $0x68] sm:$0xff]   ;;  %s1933_s12 = scalar_lea.vmem %s2311_s27, 512  ;;  %p2386_p6 = scmp.ne.s32.totalorder %s2372_s29, 0 }
  0x81   : > { %v1747_v14 = vld [vmem:[#allocation5 + $0x18] sm:$0xff]   ;;  %v1751_v18 = vld [vmem:[#allocation5 + $0x20] sm:$0xff]   ;;  %v1754_v21 = vld [vmem:[#allocation5 + $0xe8] sm:$0xff]   ;;  %p1934_p0 = scmp.ne.s32.totalorder %s2311_s27, %s1933_s12 }
  0x82   : > { %1559 = vmatpush3.bf16.msra.mxu0 %v1739_v6  ;;  %v1748_v15 = vld [vmem:[#allocation5 + $0x98] sm:$0xff]   ;;  %v1752_v19 = vld [vmem:[#allocation5 + $0xa0] sm:$0xff]   ;;  %v1755_v22 = vld [vmem:[#allocation5 + $0x28] sm:$0xff]  }
  0x83   : > { %1581 = vmatpush3.bf16.msra.mxu1 %v1740_v7  ;;  %1560 = vmatprep.subr.bf16.mxu0 %v1741_v8  ;;  %v1756_v23 = vld [vmem:[#allocation5 + $0xa8] sm:$0xff]   ;;  %v1757_v24 = vld [vmem:[#allocation5 + $0x70] sm:$0xff]   ;;  %v1761_v28 = vld [vmem:[#allocation5 + $0x78] sm:$0xff]   ;;  %p1935_p2 = pnand %p1934_p0, %p2386_p6 }
  0x84   : > { %1582 = vmatprep.subr.bf16.mxu1 %v1742_v9  ;;  %v1758_v25 = vld [vmem:[#allocation5 + $0xf0] sm:$0xff]   ;;  %v1762_v29 = vld [vmem:[#allocation5 + $0xf8] sm:$0xff]   ;;  %v313_v32 = vld [vmem:[#allocation2 + $0x8] sm:$0xff] }
  0x85   : > { %v1759_v26 = vld [vmem:[#allocation5 + $0x30] sm:$0xff]   ;;  %v1763_v30 = vld [vmem:[#allocation5 + $0x38] sm:$0xff]   ;;  %v312_v34 = vld [vmem:[#allocation2] sm:$0xff]  ;;  %v321_v35 = vpack.c.bf16 %v313_v32, %v313_v32  ;;  %p1936_p3 = pneg %p1935_p2 }
  0x86   : > { %1561 = vmatpush3.bf16.msra.mxu0 %v1743_v10  ;;  %v1760_v27 = vld [vmem:[#allocation5 + $0xb0] sm:$0xff]   ;;  %v1764_v31 = vld [vmem:[#allocation5 + $0xb8] sm:$0xff]   ;;  %v320_v37 = vpack.c.bf16 %v312_v34, %v312_v34  ;;  %v1765_v40 = vld [vmem:[#allocation5 + $0x140] sm:$0xff]  }
  0x87   : > { %1583 = vmatpush3.bf16.msra.mxu1 %v1744_v11  ;;  %1562 = vmatprep.subr.bf16.mxu0 %v1745_v12  ;;  %v315_v33 = vld [vmem:[#allocation2 + $0x18] sm:$0xff]  ;;  %v314_v38 = vld [vmem:[#allocation2 + $0x10] sm:$0xff]  ;;  %v1766_v41 = vld [vmem:[#allocation5 + $0x1c0] sm:$0xff]  }
  0x88   : > { %1584 = vmatprep.subr.bf16.mxu1 %v1746_v13  ;;  %v323_v36 = vpack.c.bf16 %v315_v33, %v315_v33  ;;  %v322_v39 = vpack.c.bf16 %v314_v38, %v314_v38  ;;  %879 = vmatprep.mubr.bf16.mxu0 %v321_v35  ;;  %v1767_v42 = vld [vmem:[#allocation5 + $0x100] sm:$0xff]   ;;  %v1769_v44 = vld [vmem:[#allocation5 + $0x148] sm:$0xff]   ;;  %v1773_v48 = vld [vmem:[#allocation5 + $0x150] sm:$0xff]  }
  0x89   : > { %v1768_v43 = vld [vmem:[#allocation5 + $0x180] sm:$0xff]   ;;  %v1770_v45 = vld [vmem:[#allocation5 + $0x1c8] sm:$0xff]   ;;  %v1774_v49 = vld [vmem:[#allocation5 + $0x1d0] sm:$0xff]  }
  0x8a   : > { %1563 = vmatpush3.bf16.msra.mxu0 %v1747_v14  ;;  %919 = vmatprep.mubr.bf16.mxu1 %v323_v36  ;;  %v1771_v46 = vld [vmem:[#allocation5 + $0x108] sm:$0xff]   ;;  %v1775_v50 = vld [vmem:[#allocation5 + $0x110] sm:$0xff]   ;;  %v1777_v52 = vld [vmem:[#allocation5 + $0x158] sm:$0xff]  }
  0x8b   : > { %1585 = vmatpush3.bf16.msra.mxu1 %v1748_v15  ;;  %1564 = vmatprep.subr.bf16.mxu0 %v1749_v16  ;;  %v1772_v47 = vld [vmem:[#allocation5 + $0x188] sm:$0xff]   ;;  %v1776_v51 = vld [vmem:[#allocation5 + $0x190] sm:$0xff]   ;;  %v1778_v53 = vld [vmem:[#allocation5 + $0x1d8] sm:$0xff]  }
  0x8c   : > { %1586 = vmatprep.subr.bf16.mxu1 %v1750_v17  ;;  %v1779_v54 = vld [vmem:[#allocation5 + $0x118] sm:$0xff]   ;;  %v1781_v56 = vld [vmem:[#allocation5 + $0x160] sm:$0xff]   ;;  %v1785_v60 = vld [vmem:[#allocation5 + $0x168] sm:$0xff]  }
  0x8d   : > { %v1780_v55 = vld [vmem:[#allocation5 + $0x198] sm:$0xff]   ;;  %v1782_v57 = vld [vmem:[#allocation5 + $0x1e0] sm:$0xff]   ;;  %v1786_v61 = vld [vmem:[#allocation5 + $0x1e8] sm:$0xff]  }
  0x8e   : > { %1565 = vmatpush3.bf16.msra.mxu0 %v1751_v18  ;;  %v1783_v58 = vld [vmem:[#allocation5 + $0x120] sm:$0xff]   ;;  %v1787_v62 = vld [vmem:[#allocation5 + $0x128] sm:$0xff]   ;;  %v1789_v0 = vld [vmem:[#allocation5 + $0x170] sm:$0xff]  }
  0x8f   : > { %1587 = vmatpush3.bf16.msra.mxu1 %v1752_v19  ;;  %1566 = vmatprep.subr.bf16.mxu0 %v1753_v20  ;;  %v1784_v59 = vld [vmem:[#allocation5 + $0x1a0] sm:$0xff]   ;;  %v1788_v63 = vld [vmem:[#allocation5 + $0x1a8] sm:$0xff]   ;;  %v1790_v1 = vld [vmem:[#allocation5 + $0x1f0] sm:$0xff]  }
  0x90   : > { %1588 = vmatprep.subr.bf16.mxu1 %v1754_v21  ;;  %v1791_v2 = vld [vmem:[#allocation5 + $0x130] sm:$0xff]   ;;  %v1793_v4 = vld [vmem:[#allocation5 + $0x178] sm:$0xff]   ;;  %v317_v8 = vld [vmem:[#allocation2 + $0x28] sm:$0xff] }
  0x91   : > { %v1792_v3 = vld [vmem:[#allocation5 + $0x1b0] sm:$0xff]   ;;  %v1794_v5 = vld [vmem:[#allocation5 + $0x1f8] sm:$0xff]   ;;  %v325_v10 = vpack.c.bf16 %v317_v8, %v317_v8  ;;  %v316_v12 = vld [vmem:[#allocation2 + $0x20] sm:$0xff] }
  0x92   : > { %1567 = vmatpush3.bf16.msra.mxu0 %v1755_v22  ;;  %v1795_v6 = vld [vmem:[#allocation5 + $0x138] sm:$0xff]   ;;  %v318_v13 = vld [vmem:[#allocation2 + $0x30] sm:$0xff]  ;;  %v324_v14 = vpack.c.bf16 %v316_v12, %v316_v12  ;;  %v1043_v12 = vlaneseq }
  0x93   : > { %1589 = vmatpush3.bf16.msra.mxu1 %v1756_v23  ;;  %1568 = vmatprep.subr.bf16.mxu0 %v1757_v24  ;;  %v1796_v7 = vld [vmem:[#allocation5 + $0x1b8] sm:$0xff]   ;;  %v326_v15 = vpack.c.bf16 %v318_v13, %v318_v13  ;;  %v1797_v16 = vld [vmem:[%s2259_s15] ss:$16 sps:$4 sm:$0xff]   ;;  %v1799_v17 = vld [vmem:[%s2259_s15 + $0x4] ss:$16 sps:$4 sm:$0xff]  }
  0x94   : > { %1590 = vmatprep.subr.bf16.mxu1 %v1758_v25  ;;  %v319_v9 = vld [vmem:[#allocation2 + $0x38] sm:$0xff]  ;;  %v1805_v20 = vld [vmem:[%s2259_s15 + $0x24] ss:$16 sps:$4 sm:$0xff]   ;;  %v1803_v22 = vld [vmem:[%s2259_s15 + $0x20] ss:$16 sps:$4 sm:$0xff]   ;;  %v1044_v13 = vshrl.u32 %v1043_v12, 7 }
  0x95   : > { %v327_v11 = vpack.c.bf16 %v319_v9, %v319_v9  ;;  %v1800_v18 = vld [vmem:[%s2259_s15 + $0x8] ss:$16 sps:$4 sm:$0xff]   ;;  %v1802_v19 = vld [vmem:[%s2259_s15 + $0xc] ss:$16 sps:$4 sm:$0xff]   ;;  %v1811_v24 = vld [vmem:[%s2259_s15 + $0x44] ss:$16 sps:$4 sm:$0xff]  }
  0x96   : > { %1569 = vmatpush3.bf16.msra.mxu0 %v1759_v26  ;;  %v1808_v21 = vld [vmem:[%s2259_s15 + $0x2c] ss:$16 sps:$4 sm:$0xff]   ;;  %v1806_v23 = vld [vmem:[%s2259_s15 + $0x28] ss:$16 sps:$4 sm:$0xff]   ;;  %v1809_v26 = vld [vmem:[%s2259_s15 + $0x40] ss:$16 sps:$4 sm:$0xff]  }
  0x97   : > { %1591 = vmatpush3.bf16.msra.mxu1 %v1760_v27  ;;  %1570 = vmatprep.subr.bf16.mxu0 %v1761_v28  ;;  %v1814_v25 = vld [vmem:[%s2259_s15 + $0x4c] ss:$16 sps:$4 sm:$0xff]   ;;  %v1812_v27 = vld [vmem:[%s2259_s15 + $0x48] ss:$16 sps:$4 sm:$0xff]   ;;  %v1817_v28 = vld [vmem:[%s2259_s15 + $0x64] ss:$16 sps:$4 sm:$0xff]  }
  0x98   : > { %1592 = vmatprep.subr.bf16.mxu1 %v1762_v29  ;;  %v1820_v29 = vld [vmem:[%s2259_s15 + $0x6c] ss:$16 sps:$4 sm:$0xff]   ;;  %v1823_v32 = vld [vmem:[%s2259_s15 + $0x84] ss:$16 sps:$4 sm:$0xff]   ;;  %v1821_v34 = vld [vmem:[%s2259_s15 + $0x80] ss:$16 sps:$4 sm:$0xff]  }
  0x99   : > { %v1826_v33 = vld [vmem:[%s2259_s15 + $0x8c] ss:$16 sps:$4 sm:$0xff]   ;;  %v1824_v35 = vld [vmem:[%s2259_s15 + $0x88] ss:$16 sps:$4 sm:$0xff]   ;;  %v1829_v36 = vld [vmem:[%s2259_s15 + $0xa4] ss:$16 sps:$4 sm:$0xff]  }
  0x9a   : > { %1571 = vmatpush3.bf16.msra.mxu0 %v1763_v30  ;;  %v1815_v30 = vld [vmem:[%s2259_s15 + $0x60] ss:$16 sps:$4 sm:$0xff]  }
  0x9b   : > { %1593 = vmatpush3.bf16.msra.mxu1 %v1764_v31  ;;  %1600 = vmatprep.subr.bf16.mxu0 %v1765_v40  ;;  %v1818_v31 = vld [vmem:[%s2259_s15 + $0x68] ss:$16 sps:$4 sm:$0xff]   ;;  %v1827_v38 = vld [vmem:[%s2259_s15 + $0xa0] ss:$16 sps:$4 sm:$0xff]   ;;  %v1835_v40 = vld [vmem:[%s2259_s15 + $0xc4] ss:$16 sps:$4 sm:$0xff]  }
  0x9c   : > { %1622 = vmatprep.subr.bf16.mxu1 %v1766_v41  ;;  %v1838_v41 = vld [vmem:[%s2259_s15 + $0xcc] ss:$16 sps:$4 sm:$0xff]  }
  0x9d   : > { %880 = vmatmul.mubr.bf16.vlgmr.msra.gmra.mrb[0].mxu0 %v320_v37  ;;  %v1832_v37 = vld [vmem:[%s2259_s15 + $0xac] ss:$16 sps:$4 sm:$0xff]  }
  0x9e   : > { %920 = vmatmul.mubr.bf16.vlgmr.msra.gmra.mrb[0].mxu1 %v322_v39  ;;  %1601 = vmatpush3.bf16.msra.mxu0 %v1767_v42  ;;  %v1830_v39 = vld [vmem:[%s2259_s15 + $0xa8] ss:$16 sps:$4 sm:$0xff]   ;;  %v1833_v42 = vld [vmem:[%s2259_s15 + $0xc0] ss:$16 sps:$4 sm:$0xff]  }
  0x9f   : > { %1623 = vmatpush3.bf16.msra.mxu1 %v1768_v43  ;;  %1602 = vmatprep.subr.bf16.mxu0 %v1769_v44  ;;  %v1836_v43 = vld [vmem:[%s2259_s15 + $0xc8] ss:$16 sps:$4 sm:$0xff]   ;;  %v1841_v44 = vld [vmem:[%s2259_s15 + $0xe4] ss:$16 sps:$4 sm:$0xff]  }
  0xa0   : > { %1624 = vmatprep.subr.bf16.mxu1 %v1770_v45  ;;  %959 = vmatprep.mubr.bf16.mxu0 %v325_v10  ;;  %v1844_v45 = vld [vmem:[%s2259_s15 + $0xec] ss:$16 sps:$4 sm:$0xff]  }
  0xa1   : > { %999 = vmatprep.mubr.bf16.mxu1 %v327_v11 }
  0xa2   : > { %1603 = vmatpush3.bf16.msra.mxu0 %v1771_v46  ;;  %v1839_v46 = vld [vmem:[%s2259_s15 + $0xe0] ss:$16 sps:$4 sm:$0xff]  }
  0xa3   : > { %1625 = vmatpush3.bf16.msra.mxu1 %v1772_v47  ;;  %1604 = vmatprep.subr.bf16.mxu0 %v1773_v48  ;;  %v1842_v47 = vld [vmem:[%s2259_s15 + $0xe8] ss:$16 sps:$4 sm:$0xff]   ;;  %v2033_v48 = vmov 0   ;;  %s2034_s15 = smov [#allocation8]  }
  0xa4   : > { %1626 = vmatprep.subr.bf16.mxu1 %v1774_v49  ;;  %s1937_s24 = sshll.u32 %s2034_s15, 4  ;;  %s1938_s24 = int_to_ptr.vmem [resolvable:$false] %s1937_s24 }
  0xa5   : > { %s1939_s28 = scalar_lea.vmem %s1938_s24, 1024  ;;  %p1940_p9 = scmp.lt.s32.totalorder %s2311_s27, %s1938_s24 }
  0xa6   : > { %1605 = vmatpush3.bf16.msra.mxu0 %v1775_v50  ;;  %p1941_p13 = scmp.lt.s32.totalorder %s1939_s28, %s1933_s12 }
  0xa7   : > { %1627 = vmatpush3.bf16.msra.mxu1 %v1776_v51  ;;  %1606 = vmatprep.subr.bf16.mxu0 %v1777_v52  ;;  %v1452_v51 = vld [vmem:[%s2360_s2] ss:$0 sm:$0xff] }
  0xa8   : > { %1628 = vmatprep.subr.bf16.mxu1 %v1778_v53  ;;  %p1942_p4 = por %p1941_p13, %p1940_p9 }
  0xaa   : > { %1607 = vmatpush3.bf16.msra.mxu0 %v1779_v54  ;;  %p1943_p8 = pnand %p1942_p4, %p1936_p3 }
  0xab   : > { %1629 = vmatpush3.bf16.msra.mxu1 %v1780_v55  ;;  %1608 = vmatprep.subr.bf16.mxu0 %v1781_v56 }
  0xac   : > { %1630 = vmatprep.subr.bf16.mxu1 %v1782_v57 }
  0xae   : > { %1609 = vmatpush3.bf16.msra.mxu0 %v1783_v58 }
  0xaf   : > { %1631 = vmatpush3.bf16.msra.mxu1 %v1784_v59  ;;  %1610 = vmatprep.subr.bf16.mxu0 %v1785_v60 }
  0xb0   : > { %1632 = vmatprep.subr.bf16.mxu1 %v1786_v61 }
  0xb2   : > { %1611 = vmatpush3.bf16.msra.mxu0 %v1787_v62 }
  0xb3   : > { %1633 = vmatpush3.bf16.msra.mxu1 %v1788_v63  ;;  %1612 = vmatprep.subr.bf16.mxu0 %v1789_v0 }
  0xb4   : > { %1634 = vmatprep.subr.bf16.mxu1 %v1790_v1 }
  0xb6   : > { %1613 = vmatpush3.bf16.msra.mxu0 %v1791_v2 }
  0xb7   : > { %1635 = vmatpush3.bf16.msra.mxu1 %v1792_v3  ;;  %1614 = vmatprep.subr.bf16.mxu0 %v1793_v4 }
  0xb8   : > { %1636 = vmatprep.subr.bf16.mxu1 %v1794_v5 }
  0xba   : > { %1615 = vmatpush3.bf16.msra.mxu0 %v1795_v6 }
  0xbb   : > { %1637 = vmatpush3.bf16.msra.mxu1 %v1796_v7  ;;  %1223 = vmatprep.subr.bf16.mxu0 %v1799_v17  ;;  %v1049_v17 = vsub.s32 1, %v1044_v13 }
  0xbc   : > { %1264 = vmatprep.subr.bf16.mxu1 %v1802_v19 }
  0xbd   : > { %960 = vmatmul.mubr.bf16.vlgmr.msra.gmra.mrb[4].mxu0 %v324_v14  ;;  %v1045_v14 = vsub.s32 0, %v1044_v13 }
  0xbe   : > { %1000 = vmatmul.mubr.bf16.vlgmr.msra.gmra.mrb[4].mxu1 %v326_v15  ;;  %1224 = vmatpush1.bf16.msra.mxu0 %v1797_v16  ;;  %v1053_v15 = vsub.s32 2, %v1044_v13  ;;  %v1041_v16 = vld [vmem:[%s308_s10] sm:$0xf] }
  0xbf   : > { %1265 = vmatpush1.bf16.msra.mxu1 %v1800_v18  ;;  %1225 = vmatprep.subr.bf16.mxu0 %v1805_v20  ;;  %v1057_v18 = vsub.s32 3, %v1044_v13  ;;  %v1046_v19 = vrot.slane %v1041_v16, %v1045_v14 }
  0xc0   : > { %1266 = vmatprep.subr.bf16.mxu1 %v1808_v21  ;;  %1255 = vmatprep.mubr.bf16.mxu0 %v2033_v48  ;;  %v1054_v20 = vrot.slane %v1041_v16, %v1053_v15  ;;  %v1050_v21 = vrot.slane %v1041_v16, %v1049_v17 }
  0xc1   : > { %1296 = vmatprep.mubr.bf16.mxu1 %v2033_v48 }
  0xc2   : > { %1226 = vmatpush1.bf16.msra.mxu0 %v1803_v22  ;;  %v1058_v22 = vrot.slane %v1041_v16, %v1057_v18 }
  0xc3   : > { %1267 = vmatpush1.bf16.msra.mxu1 %v1806_v23  ;;  %1227 = vmatprep.subr.bf16.mxu0 %v1811_v24 }
  0xc4   : > { %1268 = vmatprep.subr.bf16.mxu1 %v1814_v25 }
  0xc6   : > { %1228 = vmatpush1.bf16.msra.mxu0 %v1809_v26 }
  0xc7   : > { %1269 = vmatpush1.bf16.msra.mxu1 %v1812_v27  ;;  %1229 = vmatprep.subr.bf16.mxu0 %v1817_v28 }
  0xc8   : > { %1270 = vmatprep.subr.bf16.mxu1 %v1820_v29 }
  0xca   : > { %1230 = vmatpush1.bf16.msra.mxu0 %v1815_v30 }
  0xcb   : > { %1271 = vmatpush1.bf16.msra.mxu1 %v1818_v31  ;;  %1231 = vmatprep.subr.bf16.mxu0 %v1823_v32 }
  0xcc   : > { %1272 = vmatprep.subr.bf16.mxu1 %v1826_v33 }
  0xce   : > { %1232 = vmatpush1.bf16.msra.mxu0 %v1821_v34 }
  0xcf   : > { %1273 = vmatpush1.bf16.msra.mxu1 %v1824_v35  ;;  %1233 = vmatprep.subr.bf16.mxu0 %v1829_v36 }
  0xd0   : > { %1274 = vmatprep.subr.bf16.mxu1 %v1832_v37 }
  0xd2   : > { %1234 = vmatpush1.bf16.msra.mxu0 %v1827_v38 }
  0xd3   : > { %1275 = vmatpush1.bf16.msra.mxu1 %v1830_v39  ;;  %1235 = vmatprep.subr.bf16.mxu0 %v1835_v40 }
  0xd4   : > { %1276 = vmatprep.subr.bf16.mxu1 %v1838_v41 }
  0xd6   : > { %1236 = vmatpush1.bf16.msra.mxu0 %v1833_v42 }
  0xd7   : > { %1277 = vmatpush1.bf16.msra.mxu1 %v1836_v43  ;;  %1237 = vmatprep.subr.bf16.mxu0 %v1841_v44 }
  0xd8   : > { %1278 = vmatprep.subr.bf16.mxu1 %v1844_v45 }
  0xda   : > { %1238 = vmatpush1.bf16.msra.mxu0 %v1839_v46 }
  0xdb   : > { %1279 = vmatpush1.bf16.msra.mxu1 %v1842_v47 }
 0x170   : > { %v1572_v49 = vpop.f32.mrb[0].mxu0 }
 0x171   : > { %v1594_v50 = vpop.f32.mrb[0].mxu1  ;;  %v1573_v52 = vpop.f32.mrb[1].mxu0 }
 0x172   : > { %v1595_v53 = vpop.f32.mrb[1].mxu1  ;;  %v1574_v54 = vadd.f32 %v1573_v52, %v1572_v49  ;;  %v1575_v56 = vpop.f32.mrb[2].mxu0 }
 0x173   : > { %v1596_v55 = vadd.f32 %v1595_v53, %v1594_v50  ;;  %v1597_v57 = vpop.f32.mrb[2].mxu1  ;;  %v1576_v58 = vpop.f32.mrb[3].mxu0 }
 0x174   : > { %v1598_v59 = vpop.f32.mrb[3].mxu1  ;;  %v882_v60 = vadd.f32 %v1574_v54, %v1452_v51 }
 0x176   : > { %v922_v61 = vadd.f32 %v1596_v55, %v882_v60 }
 0x190   : > { %v1616_v62 = vpop.f32.mrb[4].mxu0 }
 0x191   : > { %v1638_v63 = vpop.f32.mrb[4].mxu1  ;;  %v1617_v0 = vpop.f32.mrb[5].mxu0 }
 0x192   : > { %v1618_v1 = vadd.f32 %v1617_v0, %v1616_v62  ;;  %v1639_v2 = vpop.f32.mrb[5].mxu1  ;;  %v1619_v3 = vpop.f32.mrb[6].mxu0 }
 0x193   : > { %v1640_v4 = vadd.f32 %v1639_v2, %v1638_v63  ;;  %v1641_v5 = vpop.f32.mrb[6].mxu1  ;;  %v1620_v6 = vpop.f32.mrb[7].mxu0 }
 0x194   : > { %v962_v7 = vadd.f32 %v1618_v1, %v922_v61  ;;  %v1642_v8 = vpop.f32.mrb[7].mxu1 }
 0x196   : > { %v1002_v9 = vadd.f32 %v1640_v4, %v962_v7 }
 0x198   : > { %1845 = vtanh.f32 %v1002_v9 }
 0x1a2   : > { %v1846_v10 = vpop.eup %1845 }
 0x1a3   : > { %v1008_v11 = vpack.c.bf16 %v1846_v10, %v1846_v10 }
 0x1a5   : > { %1256 = vmatmul.mubr.bf16.vlgmr.msra.gmra.mrb[8].mxu0 %v1008_v11  ;;  %1297 = vmatmul.mubr.bf16.vlgmr.msra.gmra.mrb[8].mxu1 %v1008_v11 }
 0x278   : > { %v1257_v23 = vpop.f32.mrb[8].mxu0  ;;  %v1298_v24 = vpop.f32.mrb[8].mxu1 }
 0x279   : > { %v1258_v25 = vadd.f32 %v1257_v23, %v1046_v19  ;;  %v1299_v26 = vadd.f32 %v1298_v24, %v1054_v20  ;;  %v1259_v27 = vpop.f32.mrb[9].mxu0  ;;  %v1300_v28 = vpop.f32.mrb[9].mxu1 }
 0x27a   : > { %v1260_v29 = vadd.f32 %v1259_v27, %v1050_v21  ;;  %v1301_v30 = vadd.f32 %v1300_v28, %v1058_v22  ;;  %v1261_v31 = vpop.f32.mrb[10].mxu0  ;;  %v1302_v32 = vpop.f32.mrb[10].mxu1 }
 0x27b   : > { %1305 = vst [vmem:[%s303_s25] sm:$0xff] %v1258_v25  ;;  %1307 = vst [vmem:[%s303_s25 + $0x10] sm:$0xff] %v1299_v26  ;;  %v1262_v33 = vpop.f32.mrb[11].mxu0  ;;  %v1303_v34 = vpop.f32.mrb[11].mxu1 }
 0x27c   : > { %1306 = vst [vmem:[%s303_s25 + $0x8] sm:$0xff] %v1260_v29  ;;  %1308 = vst [vmem:[%s303_s25 + $0x18] sm:$0xff] %v1301_v30 }
 0x27d   : > { %1946 = shalt.err (!%p1943_p8)
}
 0x27e   : > { %s1947_s0 = scalar_lea.hbm %s2309_s6, 512  ;;  %s1951_s16 = scalar_lea.hbm %s2363_s5, 1024 }
 0x27f   : > { %p1948_p12 = scmp.ne.s32.totalorder %s2309_s6, %s1947_s0  ;;  %p1952_p11 = scmp.lt.u32.totalorder %s2309_s6, %s2363_s5 }
 0x280   : > { %p1953_p7 = scmp.lt.u32.totalorder %s1951_s16, %s1947_s0  ;;  %p1955_p0 = scmp.lt.u32.totalorder %s1947_s0, %s2309_s6 }
 0x281   : > { %p1949_p5 = pnand %p1948_p12, %p2386_p6 }
 0x282   : > { %p1954_p1 = por %p1953_p7, %p1952_p11 }
 0x283   : > { %p1950_p10 = pneg %p1949_p5 }
 0x284   : > { %p1956_p2 = por %p1955_p0, %p1954_p1 }
 0x286   : > { %p1957_p3 = pnand %p1956_p2, %p1950_p10 }
 0x288   : > { %1960 = shalt.err (!%p1957_p3)
}
 0x289   : > { %1654 = dma.vmem_to_hbm [thread:$0]  (%p2386_p6), %s2311_s27, 512, %s2309_s6, %s1310_s21  }
 0x28a PF: > { %s1338_s26 = sand.u32 1, %s2003_s18   ;;  %p2387_p9 = scmp.ne.s32.totalorder %s2373_s30, 0 }
 0x28b   : > { %p2388_p13 = scmp.ge.s32.totalorder %s2023_s23, 2  ;;  %s1339_s25 = scalar_lea.sflag [#allocation4], %s1338_s26 }
 0x28d   : > { %p1668_p4 = pnand %p2388_p13, %p2387_p9 }
 0x28f   : > { %1998 = dma.done.wait (!%p1668_p4), %s1339_s25, 512  }
 0x290   : > { %2000 = vsyncadd (!%p1668_p4), %s1339_s25, 4294966784  ;;  %s20_s23 = sadd.s32 1, %s2023_s23   ;;  %s2389_s18 = smov %s2007_s19 }
 0x291   : > { %p17_p8 = scmp.ge.s32.totalorder %s20_s23, 4   ;;  %s2390_s19 = smov %s2011_s20 }
 0x292   : > { %s2391_s20 = smov %s2214_s14  ;;  %s2392_s21 = smov %s2019_s22 }
 0x293   : > { %s2393_s22 = smov %s2395_s17  ;;  %19 = sbr.rel (!%p17_p8) target bundleno = 8 (0x8), region = 96 }
 0x29a   :  { %1344 = vsyncpa [#allocation3], 1 }
 0x29b   :  { %1346 = vsyncpa [#allocation3 + $0x1], 1 }
 0x29c   :  { %1347 = vsyncpa [#allocation6], 1 }
 0x29d   :  { %1348 = vsyncpa [#allocation4], 1 }
 0x29e   :  { %1350 = vsyncpa [#allocation4 + $0x1], 1 }

// kernel: tpu_custom_call.1
= control target key start
LH: loop header
LB: loop body
LE: loop exit
PB: predicated region body
PF: predicated region fallthrough
CT: control target
= control target key end

     0   :  { %s2358_s0 = inlined_call_operand.hbm [shape: f32[8,1024], index: 0, kind: input, shape index: {}]   ;;  %s2359_s1 = inlined_call_operand.hbm [shape: bf16[1024,128], index: 1, kind: input, shape index: {}]   ;;  %s2360_s2 = inlined_call_operand.vmem [shape: f32[1,128], index: 2, kind: input, shape index: {}]   ;;  %s2361_s3 = inlined_call_operand.hbm [shape: bf16[128,1024], index: 3, kind: input, shape index: {}]   ;;  %s2362_s4 = inlined_call_operand.vmem [shape: f32[1,1024], index: 4, kind: input, shape index: {}]   ;;  %s2363_s5 = inlined_call_operand.hbm [shape: f32[8,1024], index: 5, kind: output, shape index: {}]  }
   0x1   :  { %2369 = sst [smem:[#allocation13_spill]] %s2358_s0 }
   0x2   :  { %10 = vsyncpa [#allocation3], 0 }
   0x3   :  { %11 = vsyncpa [#allocation6], 0 }
   0x4   :  { %12 = vsyncpa [#allocation4], 0 }
   0x5   :  { %14 = vsyncpa [#allocation4 + $0x1], 0  ;;  %s2065_s18 = smov 0   ;;  %s2067_s19 = smov 0  }
   0x6   :  { %s2069_s20 = smov 0   ;;  %s2071_s21 = smov 0  }
   0x7   :  { %s2073_s22 = smov 0   ;;  %s2075_s23 = smov 0  }
   0x8 LB: > { %s2096_s24 = sadd.s32 4294967295, %s2023_s23   ;;  %s1438_s25 = sadd.s32 4294967294, %s2023_s23   ;;  %s2023_s23 = sphi %s2075_s23, %s20_s23   ;;  %s2019_s22 = sphi %s2073_s22, %s2393_s22   ;;  %s2015_s21 = sphi %s2071_s21, %s2392_s21   ;;  %s2011_s20 = sphi %s2069_s20, %s2391_s20   ;;  %s2007_s19 = sphi %s2067_s19, %s2390_s19   ;;  %s2003_s18 = sphi %s2065_s18, %s2389_s18  }
   0x9   : > { %p114_p0 = scmp.ne.s32.totalorder %s2011_s20, %s2007_s19  ;;  %p115_p1 = scmp.eq.s32.totalorder %s2023_s23, 0 }
   0xa   : > { %p120_p2 = scmp.ne.s32.totalorder %s2007_s19, %s2003_s18  ;;  %p2364_p3 = scmp.eq.s32.totalorder %s2096_s24, 0 }
   0xb   : > { %p172_p4 = scmp.eq.s32.totalorder %s2096_s24, 1  ;;  %p2107_p5 = por %p115_p1, %p114_p0 }
   0xc   : > { %p178_p6 = scmp.eq.s32.totalorder %s1438_s25, 1  ;;  %p2113_p7 = por %p2364_p3, %p120_p2 }
   0xd   : > { %p2117_p8 = por %p172_p4, %p114_p0  ;;  %p1439_p10 = scmp.ge.s32.totalorder %s2023_s23, 1 }
   0xe   : > { %s2371_s28 = scalar_select %p2113_p7, 1, 0 }
   0xf   : > { %s2372_s29 = scalar_select %p2117_p8, 1, 0 }
  0x10   : > { %p2121_p9 = por %p178_p6, %p120_p2  ;;  %p185_p11 = scmp.lt.s32.totalorder %s2023_s23, 3 }
  0x11   : > { %s2025_s7 = smov [#allocation2]   ;;  %p1673_p1 = scmp.lt.s32.totalorder %s2023_s23, 2 }
  0x12   : > { %s2373_s30 = scalar_select %p2121_p9, 1, 0 }
  0x13   : > { %p2128_p13 = pnand %p1439_p10, %p185_p11  ;;  %s201_s8 = sshll.u32 %s2025_s7, 4  ;;  %s202_s8 = int_to_ptr.vmem [resolvable:$true] %s201_s8 }
  0x14   : > { %p2137_p4 = pnand %p1673_p1, %p2107_p5  ;;  %s2026_s10 = smov [#allocation5]  }
  0x15   : > { %s2374_s6 = scalar_select %p2128_p13, 1, 0 }
  0x16   : > { %p1656_p0 = pneg %p2128_p13  ;;  %s211_s11 = sshll.u32 %s2026_s10, 4  ;;  %s2147_s11 = int_to_ptr.vmem [resolvable:$true] %s211_s11 }
  0x17   : > { %s2375_s9 = scalar_select %p2137_p4, 1, 0 }
  0x18   : > { %p2143_p2 = pnand %p1656_p0, %p2364_p3  ;;  %s2377_s0 = sld [smem:[#allocation13_spill]] }
  0x1a   : > { %p1849_p6 = pneg %p2143_p2 }
  0x1e   : > { %s1847_s15 = scalar_lea.hbm %s2377_s0, 1024 }
  0x1f   : > { %p1848_p5 = scmp.ne.s32.totalorder %s2377_s0, %s1847_s15  ;;  %p1854_p1 = scmp.lt.u32.totalorder %s1847_s15, %s2377_s0 }
  0x21   : > { %p1850_p10 = pnand %p1849_p6, %p1848_p5 }
  0x23   : > { %p1851_p11 = pneg %p1850_p10 }
  0x25   : > { %p1856_p0 = pnand %p1854_p1, %p1851_p11 }
  0x27   : > { %1859 = shalt.err (!%p1856_p0)
}
  0x28   : > { %s1860_s7 = scalar_lea.vmem %s202_s8, 1024  ;;  %p1868_p8 = scmp.lt.s32.totalorder %s202_s8, %s202_s8 }
  0x29   : > { %p1861_p12 = scmp.ne.s32.totalorder %s202_s8, %s1860_s7  ;;  %p1869_p7 = scmp.lt.s32.totalorder %s1860_s7, %s1860_s7 }
  0x2b   : > { %p1863_p3 = pnand %p1861_p12, %p1849_p6  ;;  %p1870_p13 = por %p1869_p7, %p1868_p8 }
  0x2d   : > { %p1864_p9 = pneg %p1863_p3 }
  0x2f   : > { %p1871_p4 = pnand %p1870_p13, %p1864_p9 }
  0x31   : > { %1874 = shalt.err (!%p1871_p4)
}
  0x32   : > { %1659 = dma.hbm_to_vmem [thread:$0]  (!%p2143_p2), %s2377_s0, 1024, %s202_s8, [#allocation3]  }
  0x33   : > { %s1875_s16 = scalar_lea.hbm %s2359_s1, 8192 }
  0x34   : > { %p1876_p3 = scmp.ne.s32.totalorder %s2359_s1, %s1875_s16  ;;  %p1882_p9 = scmp.lt.u32.totalorder %s1875_s16, %s2359_s1 }
  0x36   : > { %p1878_p7 = pnand %p1876_p3, %p1849_p6 }
  0x38   : > { %p1879_p8 = pneg %p1878_p7 }
  0x3a   : > { %p1884_p12 = pnand %p1882_p9, %p1879_p8 }
  0x3c   : > { %1887 = shalt.err (!%p1884_p12)
}
  0x3d   : > { %s1888_s8 = scalar_lea.vmem %s2147_s11, 8192  ;;  %p1896_p10 = scmp.lt.s32.totalorder %s2147_s11, %s2147_s11 }
  0x3e   : > { %p1889_p13 = scmp.ne.s32.totalorder %s2147_s11, %s1888_s8  ;;  %p1897_p11 = scmp.lt.s32.totalorder %s1888_s8, %s1888_s8 }
  0x40   : > { %p1891_p4 = pnand %p1889_p13, %p1849_p6  ;;  %p1898_p1 = por %p1897_p11, %p1896_p10 }
  0x42   : > { %p1892_p5 = pneg %p1891_p4 }
  0x44   : > { %p1899_p0 = pnand %p1898_p1, %p1892_p5 }
  0x46   : > { %1902 = shalt.err (!%p1899_p0)
}
  0x47   : > { %s2027_s10 = smov 64   ;;  %s2028_s13 = smov 4  }
  0x48   : > { %1662 = dma.hbm_to_vmem [thread:$0]  (!%p2143_p2), %s2359_s1, 8192, %s2147_s11, [#allocation6], %s2027_s10, %s2027_s10, %s2028_s13  }
  0x49   : > { %s228_s16 = sand.u32 1, %s2023_s23   ;;  %s29_s17 = sadd.s32 1, %s2019_s22 }
  0x4a   : > { %s230_s25 = sand.u32 1, %s2011_s20   ;;  %p30_p6 = scmp.ge.s32.totalorder %s29_s17, 2 }
  0x4b   : > { %s1443_s27 = sshll.u32 %s230_s25, 8  ;;  %s1554_s7 = sshll.u32 %s2019_s22, 8 }
  0x4c   : > { %s2395_s17 = smov (%p30_p6, %s29_s17), 0  ;;  %s2205_s0 = scalar_lea.hbm %s2361_s3, %s1554_s7 }
  0x4d   : > { %s232_s11 = scalar_lea.vmem [#allocation7], %s1443_s27  ;;  %s104_s10 = ssub.s32 %s2019_s22, %s2395_s17 }
  0x4e   : > { %s239_s12 = sshll.u32 %s232_s11, 4  ;;  %p105_p2 = scmp.eq.s32.totalorder %s104_s10, 0  ;;  %s2209_s12 = int_to_ptr.vmem [resolvable:$true] %s239_s12 }
  0x4f   : > { %s2378_s13 = sadd.s32 1, %s2011_s20  ;;  %s2216_s15 = scalar_lea.sflag [#allocation3], %s228_s16 }
  0x50   : > { %s2214_s14 = scalar_select %p105_p2, %s2011_s20, %s2378_s13  }
  0x51   : > { %s1903_s25 = scalar_lea.hbm %s2205_s0, 4096  ;;  %p2379_p7 = scmp.ne.s32.totalorder %s2375_s9, 0 }
  0x52   : > { %p1904_p3 = scmp.ne.s32.totalorder %s2205_s0, %s1903_s25  ;;  %s1908_s7 = scalar_lea.hbm %s2361_s3, 8192 }
  0x53   : > { %p1905_p8 = pneg %p2379_p7  ;;  %p1909_p13 = scmp.lt.u32.totalorder %s2205_s0, %s2361_s3 }
  0x54   : > { %p1910_p4 = scmp.lt.u32.totalorder %s1908_s7, %s1903_s25  ;;  %p1912_p10 = scmp.lt.u32.totalorder %s1903_s25, %s2205_s0 }
  0x55   : > { %p1906_p9 = pnand %p1905_p8, %p1904_p3 }
  0x56   : > { %p1911_p5 = por %p1910_p4, %p1909_p13 }
  0x57   : > { %p1907_p12 = pneg %p1906_p9 }
  0x58   : > { %p1913_p11 = por %p1912_p10, %p1911_p5 }
  0x5a   : > { %p1914_p1 = pnand %p1913_p11, %p1907_p12 }
  0x5c   : > { %1917 = shalt.err (!%p1914_p1)
}
  0x5d   : > { %s1918_s16 = scalar_lea.vmem %s2209_s12, 4096  ;;  %s2029_s10 = smov [#allocation7]  }
  0x5e   : > { %p1919_p0 = scmp.ne.s32.totalorder %s2209_s12, %s1918_s16  ;;  %s1923_s13 = sshll.u32 %s2029_s10, 4  ;;  %s1924_s13 = int_to_ptr.vmem [resolvable:$false] %s1923_s13 }
  0x5f   : > { %s1925_s26 = scalar_lea.vmem %s1924_s13, 8192  ;;  %p1926_p3 = scmp.lt.s32.totalorder %s2209_s12, %s1924_s13 }
  0x60   : > { %p1921_p6 = pnand %p1919_p0, %p1905_p8  ;;  %p1927_p9 = scmp.lt.s32.totalorder %s1925_s26, %s1918_s16 }
  0x62   : > { %p1922_p2 = pneg %p1921_p6  ;;  %p1928_p13 = por %p1927_p9, %p1926_p3 }
  0x64   : > { %p1929_p4 = pnand %p1928_p13, %p1922_p2 }
  0x66   : > { %1932 = shalt.err (!%p1929_p4)
}
  0x67   : > { %s2030_s25 = smov 512   ;;  %s2031_s27 = smov 256  }
  0x68   : > { %s2032_s7 = smov 16   ;;  %p2380_p8 = scmp.ne.s32.totalorder %s2374_s6, 0 }
  0x69   : > { %1666 = dma.hbm_to_vmem [thread:$0]  (!%p2379_p7), %s2205_s0, 4096, %s2209_s12, %s2216_s15, %s2030_s25, %s2031_s27, %s2032_s7  }
  0x6a   : > { %259 = sbr.rel (%p2380_p8) target bundleno = 650 (0x28a), region = 40  ;;  %p2381_p12 = scmp.eq.s32.totalorder (!%p2380_p8), %s2096_s24, 0 }
  0x71   : > { %1986 = dma.done.wait (%p2381_p12), [#allocation3], 1024   ;;  %p2382_p5 = pmov %p2381_p12 }
  0x73   : > { %1988 = vsyncadd (%p2382_p5), [#allocation3], 4294966272  ;;  %p2383_p10 = pmov %p2382_p5 }
  0x74   : > { %p2384_p11 = pmov %p2382_p5 }
  0x75   : > { %1990 = dma.done.wait (%p2383_p10), [#allocation6], 8192  }
  0x76   : > { %1992 = vsyncadd (%p2384_p11), [#allocation6], 4294959104  ;;  %s269_s9 = sand.u32 1, %s2096_s24   ;;  %s2256_s0 = sand.u32 1, %s2007_s19  }
  0x77   : > { %s1449_s6 = sshll.u32 %s2256_s0, 8  ;;  %s270_s12 = scalar_lea.sflag [#allocation3], %s269_s9 }
  0x78   : > { %s2259_s15 = scalar_lea.vmem [#allocation7], %s1449_s6  ;;  %p2385_p7 = scmp.ne.s32.totalorder %s2371_s28, 0 }
  0x7a   : > { %1994 = dma.done.wait (%p2385_p7), %s270_s12, 4096  }
  0x7b   : > { %1996 = vsyncadd (%p2385_p7), %s270_s12, 4294963200  ;;  %v1733_v0 = vld [vmem:[#allocation5 + $0x40] sm:$0xff]   ;;  %v1737_v4 = vld [vmem:[#allocation5 + $0x48] sm:$0xff]   ;;  %s1451_s8 = sshll.u32 %s2015_s21, 2  ;;  %s1450_s13 = sshll.u32 %s2256_s0, 5 }
  0x7c   : > { %v1734_v1 = vld [vmem:[#allocation5 + $0xc0] sm:$0xff]   ;;  %1556 = vmatprep.subr.bf16.mxu0 %v1733_v0  ;;  %v1738_v5 = vld [vmem:[#allocation5 + $0xc8] sm:$0xff]   ;;  %v1741_v8 = vld [vmem:[#allocation5 + $0x50] sm:$0xff]   ;;  %p306_p1 = scmp.lt.s32.totalorder %s1451_s8, 7  ;;  %s1555_s26 = sshll.u32 %s2015_s21, 9 }
  0x7d   : > { %v1735_v2 = vld [vmem:[#allocation5] sm:$0xff]   ;;  %1578 = vmatprep.subr.bf16.mxu1 %v1734_v1  ;;  %v1739_v6 = vld [vmem:[#allocation5 + $0x8] sm:$0xff]   ;;  %v1742_v9 = vld [vmem:[#allocation5 + $0xd0] sm:$0xff]   ;;  %s303_s25 = scalar_lea.vmem [#allocation8], %s1450_s13  ;;  %s2309_s6 = scalar_lea.hbm %s2363_s5, %s1555_s26 }
  0x7e   : > { %v1736_v3 = vld [vmem:[#allocation5 + $0x80] sm:$0xff]   ;;  %1557 = vmatpush3.bf16.msra.mxu0 %v1735_v2  ;;  %v1740_v7 = vld [vmem:[#allocation5 + $0x88] sm:$0xff]   ;;  %v1743_v10 = vld [vmem:[#allocation5 + $0x10] sm:$0xff]   ;;  %s2397_s8 = smov (!%p306_p1, %s1451_s8), 7  ;;  %s1326_s27 = sshll.u32 %s303_s25, 4  ;;  %s2311_s27 = int_to_ptr.vmem [resolvable:$true] %s1326_s27 }
  0x7f   : > { %1579 = vmatpush3.bf16.msra.mxu1 %v1736_v3  ;;  %1558 = vmatprep.subr.bf16.mxu0 %v1737_v4  ;;  %v1744_v11 = vld [vmem:[#allocation5 + $0x90] sm:$0xff]   ;;  %v1745_v12 = vld [vmem:[#allocation5 + $0x58] sm:$0xff]   ;;  %v1749_v16 = vld [vmem:[#allocation5 + $0x60] sm:$0xff]   ;;  %s308_s10 = scalar_lea.vmem %s2362_s4, %s2397_s8  ;;  %s1310_s21 = scalar_lea.sflag [#allocation4], %s2256_s0 }
  0x80   : > { %1580 = vmatprep.subr.bf16.mxu1 %v1738_v5  ;;  %v1746_v13 = vld [vmem:[#allocation5 + $0xd8] sm:$0xff]   ;;  %v1750_v17 = vld [vmem:[#allocation5 + $0xe0] sm:$0xff]   ;;  %v1753_v20 = vld [vmem:[#allocation5 + $0x68] sm:$0xff]   ;;  %s1933_s12 = scalar_lea.vmem %s2311_s27, 512  ;;  %p2386_p6 = scmp.ne.s32.totalorder %s2372_s29, 0 }
  0x81   : > { %v1747_v14 = vld [vmem:[#allocation5 + $0x18] sm:$0xff]   ;;  %v1751_v18 = vld [vmem:[#allocation5 + $0x20] sm:$0xff]   ;;  %v1754_v21 = vld [vmem:[#allocation5 + $0xe8] sm:$0xff]   ;;  %p1934_p0 = scmp.ne.s32.totalorder %s2311_s27, %s1933_s12 }
  0x82   : > { %1559 = vmatpush3.bf16.msra.mxu0 %v1739_v6  ;;  %v1748_v15 = vld [vmem:[#allocation5 + $0x98] sm:$0xff]   ;;  %v1752_v19 = vld [vmem:[#allocation5 + $0xa0] sm:$0xff]   ;;  %v1755_v22 = vld [vmem:[#allocation5 + $0x28] sm:$0xff]  }
  0x83   : > { %1581 = vmatpush3.bf16.msra.mxu1 %v1740_v7  ;;  %1560 = vmatprep.subr.bf16.mxu0 %v1741_v8  ;;  %v1756_v23 = vld [vmem:[#allocation5 + $0xa8] sm:$0xff]   ;;  %v1757_v24 = vld [vmem:[#allocation5 + $0x70] sm:$0xff]   ;;  %v1761_v28 = vld [vmem:[#allocation5 + $0x78] sm:$0xff]   ;;  %p1935_p2 = pnand %p1934_p0, %p2386_p6 }
  0x84   : > { %1582 = vmatprep.subr.bf16.mxu1 %v1742_v9  ;;  %v1758_v25 = vld [vmem:[#allocation5 + $0xf0] sm:$0xff]   ;;  %v1762_v29 = vld [vmem:[#allocation5 + $0xf8] sm:$0xff]   ;;  %v313_v32 = vld [vmem:[#allocation2 + $0x8] sm:$0xff] }
  0x85   : > { %v1759_v26 = vld [vmem:[#allocation5 + $0x30] sm:$0xff]   ;;  %v1763_v30 = vld [vmem:[#allocation5 + $0x38] sm:$0xff]   ;;  %v312_v34 = vld [vmem:[#allocation2] sm:$0xff]  ;;  %v321_v35 = vpack.c.bf16 %v313_v32, %v313_v32  ;;  %p1936_p3 = pneg %p1935_p2 }
  0x86   : > { %1561 = vmatpush3.bf16.msra.mxu0 %v1743_v10  ;;  %v1760_v27 = vld [vmem:[#allocation5 + $0xb0] sm:$0xff]   ;;  %v1764_v31 = vld [vmem:[#allocation5 + $0xb8] sm:$0xff]   ;;  %v320_v37 = vpack.c.bf16 %v312_v34, %v312_v34  ;;  %v1765_v40 = vld [vmem:[#allocation5 + $0x140] sm:$0xff]  }
  0x87   : > { %1583 = vmatpush3.bf16.msra.mxu1 %v1744_v11  ;;  %1562 = vmatprep.subr.bf16.mxu0 %v1745_v12  ;;  %v315_v33 = vld [vmem:[#allocation2 + $0x18] sm:$0xff]  ;;  %v314_v38 = vld [vmem:[#allocation2 + $0x10] sm:$0xff]  ;;  %v1766_v41 = vld [vmem:[#allocation5 + $0x1c0] sm:$0xff]  }
  0x88   : > { %1584 = vmatprep.subr.bf16.mxu1 %v1746_v13  ;;  %v323_v36 = vpack.c.bf16 %v315_v33, %v315_v33  ;;  %v322_v39 = vpack.c.bf16 %v314_v38, %v314_v38  ;;  %879 = vmatprep.mubr.bf16.mxu0 %v321_v35  ;;  %v1767_v42 = vld [vmem:[#allocation5 + $0x100] sm:$0xff]   ;;  %v1769_v44 = vld [vmem:[#allocation5 + $0x148] sm:$0xff]   ;;  %v1773_v48 = vld [vmem:[#allocation5 + $0x150] sm:$0xff]  }
  0x89   : > { %v1768_v43 = vld [vmem:[#allocation5 + $0x180] sm:$0xff]   ;;  %v1770_v45 = vld [vmem:[#allocation5 + $0x1c8] sm:$0xff]   ;;  %v1774_v49 = vld [vmem:[#allocation5 + $0x1d0] sm:$0xff]  }
  0x8a   : > { %1563 = vmatpush3.bf16.msra.mxu0 %v1747_v14  ;;  %919 = vmatprep.mubr.bf16.mxu1 %v323_v36  ;;  %v1771_v46 = vld [vmem:[#allocation5 + $0x108] sm:$0xff]   ;;  %v1775_v50 = vld [vmem:[#allocation5 + $0x110] sm:$0xff]   ;;  %v1777_v52 = vld [vmem:[#allocation5 + $0x158] sm:$0xff]  }
  0x8b   : > { %1585 = vmatpush3.bf16.msra.mxu1 %v1748_v15  ;;  %1564 = vmatprep.subr.bf16.mxu0 %v1749_v16  ;;  %v1772_v47 = vld [vmem:[#allocation5 + $0x188] sm:$0xff]   ;;  %v1776_v51 = vld [vmem:[#allocation5 + $0x190] sm:$0xff]   ;;  %v1778_v53 = vld [vmem:[#allocation5 + $0x1d8] sm:$0xff]  }
  0x8c   : > { %1586 = vmatprep.subr.bf16.mxu1 %v1750_v17  ;;  %v1779_v54 = vld [vmem:[#allocation5 + $0x118] sm:$0xff]   ;;  %v1781_v56 = vld [vmem:[#allocation5 + $0x160] sm:$0xff]   ;;  %v1785_v60 = vld [vmem:[#allocation5 + $0x168] sm:$0xff]  }
  0x8d   : > { %v1780_v55 = vld [vmem:[#allocation5 + $0x198] sm:$0xff]   ;;  %v1782_v57 = vld [vmem:[#allocation5 + $0x1e0] sm:$0xff]   ;;  %v1786_v61 = vld [vmem:[#allocation5 + $0x1e8] sm:$0xff]  }
  0x8e   : > { %1565 = vmatpush3.bf16.msra.mxu0 %v1751_v18  ;;  %v1783_v58 = vld [vmem:[#allocation5 + $0x120] sm:$0xff]   ;;  %v1787_v62 = vld [vmem:[#allocation5 + $0x128] sm:$0xff]   ;;  %v1789_v0 = vld [vmem:[#allocation5 + $0x170] sm:$0xff]  }
  0x8f   : > { %1587 = vmatpush3.bf16.msra.mxu1 %v1752_v19  ;;  %1566 = vmatprep.subr.bf16.mxu0 %v1753_v20  ;;  %v1784_v59 = vld [vmem:[#allocation5 + $0x1a0] sm:$0xff]   ;;  %v1788_v63 = vld [vmem:[#allocation5 + $0x1a8] sm:$0xff]   ;;  %v1790_v1 = vld [vmem:[#allocation5 + $0x1f0] sm:$0xff]  }
  0x90   : > { %1588 = vmatprep.subr.bf16.mxu1 %v1754_v21  ;;  %v1791_v2 = vld [vmem:[#allocation5 + $0x130] sm:$0xff]   ;;  %v1793_v4 = vld [vmem:[#allocation5 + $0x178] sm:$0xff]   ;;  %v317_v8 = vld [vmem:[#allocation2 + $0x28] sm:$0xff] }
  0x91   : > { %v1792_v3 = vld [vmem:[#allocation5 + $0x1b0] sm:$0xff]   ;;  %v1794_v5 = vld [vmem:[#allocation5 + $0x1f8] sm:$0xff]   ;;  %v325_v10 = vpack.c.bf16 %v317_v8, %v317_v8  ;;  %v316_v12 = vld [vmem:[#allocation2 + $0x20] sm:$0xff] }
  0x92   : > { %1567 = vmatpush3.bf16.msra.mxu0 %v1755_v22  ;;  %v1795_v6 = vld [vmem:[#allocation5 + $0x138] sm:$0xff]   ;;  %v318_v13 = vld [vmem:[#allocation2 + $0x30] sm:$0xff]  ;;  %v324_v14 = vpack.c.bf16 %v316_v12, %v316_v12  ;;  %v1043_v12 = vlaneseq }
  0x93   : > { %1589 = vmatpush3.bf16.msra.mxu1 %v1756_v23  ;;  %1568 = vmatprep.subr.bf16.mxu0 %v1757_v24  ;;  %v1796_v7 = vld [vmem:[#allocation5 + $0x1b8] sm:$0xff]   ;;  %v326_v15 = vpack.c.bf16 %v318_v13, %v318_v13  ;;  %v1797_v16 = vld [vmem:[%s2259_s15] ss:$16 sps:$4 sm:$0xff]   ;;  %v1799_v17 = vld [vmem:[%s2259_s15 + $0x4] ss:$16 sps:$4 sm:$0xff]  }
  0x94   : > { %1590 = vmatprep.subr.bf16.mxu1 %v1758_v25  ;;  %v319_v9 = vld [vmem:[#allocation2 + $0x38] sm:$0xff]  ;;  %v1805_v20 = vld [vmem:[%s2259_s15 + $0x24] ss:$16 sps:$4 sm:$0xff]   ;;  %v1803_v22 = vld [vmem:[%s2259_s15 + $0x20] ss:$16 sps:$4 sm:$0xff]   ;;  %v1044_v13 = vshrl.u32 %v1043_v12, 7 }
  0x95   : > { %v327_v11 = vpack.c.bf16 %v319_v9, %v319_v9  ;;  %v1800_v18 = vld [vmem:[%s2259_s15 + $0x8] ss:$16 sps:$4 sm:$0xff]   ;;  %v1802_v19 = vld [vmem:[%s2259_s15 + $0xc] ss:$16 sps:$4 sm:$0xff]   ;;  %v1811_v24 = vld [vmem:[%s2259_s15 + $0x44] ss:$16 sps:$4 sm:$0xff]  }
  0x96   : > { %1569 = vmatpush3.bf16.msra.mxu0 %v1759_v26  ;;  %v1808_v21 = vld [vmem:[%s2259_s15 + $0x2c] ss:$16 sps:$4 sm:$0xff]   ;;  %v1806_v23 = vld [vmem:[%s2259_s15 + $0x28] ss:$16 sps:$4 sm:$0xff]   ;;  %v1809_v26 = vld [vmem:[%s2259_s15 + $0x40] ss:$16 sps:$4 sm:$0xff]  }
  0x97   : > { %1591 = vmatpush3.bf16.msra.mxu1 %v1760_v27  ;;  %1570 = vmatprep.subr.bf16.mxu0 %v1761_v28  ;;  %v1814_v25 = vld [vmem:[%s2259_s15 + $0x4c] ss:$16 sps:$4 sm:$0xff]   ;;  %v1812_v27 = vld [vmem:[%s2259_s15 + $0x48] ss:$16 sps:$4 sm:$0xff]   ;;  %v1817_v28 = vld [vmem:[%s2259_s15 + $0x64] ss:$16 sps:$4 sm:$0xff]  }
  0x98   : > { %1592 = vmatprep.subr.bf16.mxu1 %v1762_v29  ;;  %v1820_v29 = vld [vmem:[%s2259_s15 + $0x6c] ss:$16 sps:$4 sm:$0xff]   ;;  %v1823_v32 = vld [vmem:[%s2259_s15 + $0x84] ss:$16 sps:$4 sm:$0xff]   ;;  %v1821_v34 = vld [vmem:[%s2259_s15 + $0x80] ss:$16 sps:$4 sm:$0xff]  }
  0x99   : > { %v1826_v33 = vld [vmem:[%s2259_s15 + $0x8c] ss:$16 sps:$4 sm:$0xff]   ;;  %v1824_v35 = vld [vmem:[%s2259_s15 + $0x88] ss:$16 sps:$4 sm:$0xff]   ;;  %v1829_v36 = vld [vmem:[%s2259_s15 + $0xa4] ss:$16 sps:$4 sm:$0xff]  }
  0x9a   : > { %1571 = vmatpush3.bf16.msra.mxu0 %v1763_v30  ;;  %v1815_v30 = vld [vmem:[%s2259_s15 + $0x60] ss:$16 sps:$4 sm:$0xff]  }
  0x9b   : > { %1593 = vmatpush3.bf16.msra.mxu1 %v1764_v31  ;;  %1600 = vmatprep.subr.bf16.mxu0 %v1765_v40  ;;  %v1818_v31 = vld [vmem:[%s2259_s15 + $0x68] ss:$16 sps:$4 sm:$0xff]   ;;  %v1827_v38 = vld [vmem:[%s2259_s15 + $0xa0] ss:$16 sps:$4 sm:$0xff]   ;;  %v1835_v40 = vld [vmem:[%s2259_s15 + $0xc4] ss:$16 sps:$4 sm:$0xff]  }
  0x9c   : > { %1622 = vmatprep.subr.bf16.mxu1 %v1766_v41  ;;  %v1838_v41 = vld [vmem:[%s2259_s15 + $0xcc] ss:$16 sps:$4 sm:$0xff]  }
  0x9d   : > { %880 = vmatmul.mubr.bf16.vlgmr.msra.gmra.mrb[0].mxu0 %v320_v37  ;;  %v1832_v37 = vld [vmem:[%s2259_s15 + $0xac] ss:$16 sps:$4 sm:$0xff]  }
  0x9e   : > { %920 = vmatmul.mubr.bf16.vlgmr.msra.gmra.mrb[0].mxu1 %v322_v39  ;;  %1601 = vmatpush3.bf16.msra.mxu0 %v1767_v42  ;;  %v1830_v39 = vld [vmem:[%s2259_s15 + $0xa8] ss:$16 sps:$4 sm:$0xff]   ;;  %v1833_v42 = vld [vmem:[%s2259_s15 + $0xc0] ss:$16 sps:$4 sm:$0xff]  }
  0x9f   : > { %1623 = vmatpush3.bf16.msra.mxu1 %v1768_v43  ;;  %1602 = vmatprep.subr.bf16.mxu0 %v1769_v44  ;;  %v1836_v43 = vld [vmem:[%s2259_s15 + $0xc8] ss:$16 sps:$4 sm:$0xff]   ;;  %v1841_v44 = vld [vmem:[%s2259_s15 + $0xe4] ss:$16 sps:$4 sm:$0xff]  }
  0xa0   : > { %1624 = vmatprep.subr.bf16.mxu1 %v1770_v45  ;;  %959 = vmatprep.mubr.bf16.mxu0 %v325_v10  ;;  %v1844_v45 = vld [vmem:[%s2259_s15 + $0xec] ss:$16 sps:$4 sm:$0xff]  }
  0xa1   : > { %999 = vmatprep.mubr.bf16.mxu1 %v327_v11 }
  0xa2   : > { %1603 = vmatpush3.bf16.msra.mxu0 %v1771_v46  ;;  %v1839_v46 = vld [vmem:[%s2259_s15 + $0xe0] ss:$16 sps:$4 sm:$0xff]  }
  0xa3   : > { %1625 = vmatpush3.bf16.msra.mxu1 %v1772_v47  ;;  %1604 = vmatprep.subr.bf16.mxu0 %v1773_v48  ;;  %v1842_v47 = vld [vmem:[%s2259_s15 + $0xe8] ss:$16 sps:$4 sm:$0xff]   ;;  %v2033_v48 = vmov 0   ;;  %s2034_s15 = smov [#allocation8]  }
  0xa4   : > { %1626 = vmatprep.subr.bf16.mxu1 %v1774_v49  ;;  %s1937_s24 = sshll.u32 %s2034_s15, 4  ;;  %s1938_s24 = int_to_ptr.vmem [resolvable:$false] %s1937_s24 }
  0xa5   : > { %s1939_s28 = scalar_lea.vmem %s1938_s24, 1024  ;;  %p1940_p9 = scmp.lt.s32.totalorder %s2311_s27, %s1938_s24 }
  0xa6   : > { %1605 = vmatpush3.bf16.msra.mxu0 %v1775_v50  ;;  %p1941_p13 = scmp.lt.s32.totalorder %s1939_s28, %s1933_s12 }
  0xa7   : > { %1627 = vmatpush3.bf16.msra.mxu1 %v1776_v51  ;;  %1606 = vmatprep.subr.bf16.mxu0 %v1777_v52  ;;  %v1452_v51 = vld [vmem:[%s2360_s2] ss:$0 sm:$0xff] }
  0xa8   : > { %1628 = vmatprep.subr.bf16.mxu1 %v1778_v53  ;;  %p1942_p4 = por %p1941_p13, %p1940_p9 }
  0xaa   : > { %1607 = vmatpush3.bf16.msra.mxu0 %v1779_v54  ;;  %p1943_p8 = pnand %p1942_p4, %p1936_p3 }
  0xab   : > { %1629 = vmatpush3.bf16.msra.mxu1 %v1780_v55  ;;  %1608 = vmatprep.subr.bf16.mxu0 %v1781_v56 }
  0xac   : > { %1630 = vmatprep.subr.bf16.mxu1 %v1782_v57 }
  0xae   : > { %1609 = vmatpush3.bf16.msra.mxu0 %v1783_v58 }
  0xaf   : > { %1631 = vmatpush3.bf16.msra.mxu1 %v1784_v59  ;;  %1610 = vmatprep.subr.bf16.mxu0 %v1785_v60 }
  0xb0   : > { %1632 = vmatprep.subr.bf16.mxu1 %v1786_v61 }
  0xb2   : > { %1611 = vmatpush3.bf16.msra.mxu0 %v1787_v62 }
  0xb3   : > { %1633 = vmatpush3.bf16.msra.mxu1 %v1788_v63  ;;  %1612 = vmatprep.subr.bf16.mxu0 %v1789_v0 }
  0xb4   : > { %1634 = vmatprep.subr.bf16.mxu1 %v1790_v1 }
  0xb6   : > { %1613 = vmatpush3.bf16.msra.mxu0 %v1791_v2 }
  0xb7   : > { %1635 = vmatpush3.bf16.msra.mxu1 %v1792_v3  ;;  %1614 = vmatprep.subr.bf16.mxu0 %v1793_v4 }
  0xb8   : > { %1636 = vmatprep.subr.bf16.mxu1 %v1794_v5 }
  0xba   : > { %1615 = vmatpush3.bf16.msra.mxu0 %v1795_v6 }
  0xbb   : > { %1637 = vmatpush3.bf16.msra.mxu1 %v1796_v7  ;;  %1223 = vmatprep.subr.bf16.mxu0 %v1799_v17  ;;  %v1049_v17 = vsub.s32 1, %v1044_v13 }
  0xbc   : > { %1264 = vmatprep.subr.bf16.mxu1 %v1802_v19 }
  0xbd   : > { %960 = vmatmul.mubr.bf16.vlgmr.msra.gmra.mrb[4].mxu0 %v324_v14  ;;  %v1045_v14 = vsub.s32 0, %v1044_v13 }
  0xbe   : > { %1000 = vmatmul.mubr.bf16.vlgmr.msra.gmra.mrb[4].mxu1 %v326_v15  ;;  %1224 = vmatpush1.bf16.msra.mxu0 %v1797_v16  ;;  %v1053_v15 = vsub.s32 2, %v1044_v13  ;;  %v1041_v16 = vld [vmem:[%s308_s10] sm:$0xf] }
  0xbf   : > { %1265 = vmatpush1.bf16.msra.mxu1 %v1800_v18  ;;  %1225 = vmatprep.subr.bf16.mxu0 %v1805_v20  ;;  %v1057_v18 = vsub.s32 3, %v1044_v13  ;;  %v1046_v19 = vrot.slane %v1041_v16, %v1045_v14 }
  0xc0   : > { %1266 = vmatprep.subr.bf16.mxu1 %v1808_v21  ;;  %1255 = vmatprep.mubr.bf16.mxu0 %v2033_v48  ;;  %v1054_v20 = vrot.slane %v1041_v16, %v1053_v15  ;;  %v1050_v21 = vrot.slane %v1041_v16, %v1049_v17 }
  0xc1   : > { %1296 = vmatprep.mubr.bf16.mxu1 %v2033_v48 }
  0xc2   : > { %1226 = vmatpush1.bf16.msra.mxu0 %v1803_v22  ;;  %v1058_v22 = vrot.slane %v1041_v16, %v1057_v18 }
  0xc3   : > { %1267 = vmatpush1.bf16.msra.mxu1 %v1806_v23  ;;  %1227 = vmatprep.subr.bf16.mxu0 %v1811_v24 }
  0xc4   : > { %1268 = vmatprep.subr.bf16.mxu1 %v1814_v25 }
  0xc6   : > { %1228 = vmatpush1.bf16.msra.mxu0 %v1809_v26 }
  0xc7   : > { %1269 = vmatpush1.bf16.msra.mxu1 %v1812_v27  ;;  %1229 = vmatprep.subr.bf16.mxu0 %v1817_v28 }
  0xc8   : > { %1270 = vmatprep.subr.bf16.mxu1 %v1820_v29 }
  0xca   : > { %1230 = vmatpush1.bf16.msra.mxu0 %v1815_v30 }
  0xcb   : > { %1271 = vmatpush1.bf16.msra.mxu1 %v1818_v31  ;;  %1231 = vmatprep.subr.bf16.mxu0 %v1823_v32 }
  0xcc   : > { %1272 = vmatprep.subr.bf16.mxu1 %v1826_v33 }
  0xce   : > { %1232 = vmatpush1.bf16.msra.mxu0 %v1821_v34 }
  0xcf   : > { %1273 = vmatpush1.bf16.msra.mxu1 %v1824_v35  ;;  %1233 = vmatprep.subr.bf16.mxu0 %v1829_v36 }
  0xd0   : > { %1274 = vmatprep.subr.bf16.mxu1 %v1832_v37 }
  0xd2   : > { %1234 = vmatpush1.bf16.msra.mxu0 %v1827_v38 }
  0xd3   : > { %1275 = vmatpush1.bf16.msra.mxu1 %v1830_v39  ;;  %1235 = vmatprep.subr.bf16.mxu0 %v1835_v40 }
  0xd4   : > { %1276 = vmatprep.subr.bf16.mxu1 %v1838_v41 }
  0xd6   : > { %1236 = vmatpush1.bf16.msra.mxu0 %v1833_v42 }
  0xd7   : > { %1277 = vmatpush1.bf16.msra.mxu1 %v1836_v43  ;;  %1237 = vmatprep.subr.bf16.mxu0 %v1841_v44 }
  0xd8   : > { %1278 = vmatprep.subr.bf16.mxu1 %v1844_v45 }
  0xda   : > { %1238 = vmatpush1.bf16.msra.mxu0 %v1839_v46 }
  0xdb   : > { %1279 = vmatpush1.bf16.msra.mxu1 %v1842_v47 }
 0x170   : > { %v1572_v49 = vpop.f32.mrb[0].mxu0 }
 0x171   : > { %v1594_v50 = vpop.f32.mrb[0].mxu1  ;;  %v1573_v52 = vpop.f32.mrb[1].mxu0 }
 0x172   : > { %v1595_v53 = vpop.f32.mrb[1].mxu1  ;;  %v1574_v54 = vadd.f32 %v1573_v52, %v1572_v49  ;;  %v1575_v56 = vpop.f32.mrb[2].mxu0 }
 0x173   : > { %v1596_v55 = vadd.f32 %v1595_v53, %v1594_v50  ;;  %v1597_v57 = vpop.f32.mrb[2].mxu1  ;;  %v1576_v58 = vpop.f32.mrb[3].mxu0 }
 0x174   : > { %v1598_v59 = vpop.f32.mrb[3].mxu1  ;;  %v882_v60 = vadd.f32 %v1574_v54, %v1452_v51 }
 0x176   : > { %v922_v61 = vadd.f32 %v1596_v55, %v882_v60 }
 0x190   : > { %v1616_v62 = vpop.f32.mrb[4].mxu0 }
 0x191   : > { %v1638_v63 = vpop.f32.mrb[4].mxu1  ;;  %v1617_v0 = vpop.f32.mrb[5].mxu0 }
 0x192   : > { %v1618_v1 = vadd.f32 %v1617_v0, %v1616_v62  ;;  %v1639_v2 = vpop.f32.mrb[5].mxu1  ;;  %v1619_v3 = vpop.f32.mrb[6].mxu0 }
 0x193   : > { %v1640_v4 = vadd.f32 %v1639_v2, %v1638_v63  ;;  %v1641_v5 = vpop.f32.mrb[6].mxu1  ;;  %v1620_v6 = vpop.f32.mrb[7].mxu0 }
 0x194   : > { %v962_v7 = vadd.f32 %v1618_v1, %v922_v61  ;;  %v1642_v8 = vpop.f32.mrb[7].mxu1 }
 0x196   : > { %v1002_v9 = vadd.f32 %v1640_v4, %v962_v7 }
 0x198   : > { %1845 = vtanh.f32 %v1002_v9 }
 0x1a2   : > { %v1846_v10 = vpop.eup %1845 }
 0x1a3   : > { %v1008_v11 = vpack.c.bf16 %v1846_v10, %v1846_v10 }
 0x1a5   : > { %1256 = vmatmul.mubr.bf16.vlgmr.msra.gmra.mrb[8].mxu0 %v1008_v11  ;;  %1297 = vmatmul.mubr.bf16.vlgmr.msra.gmra.mrb[8].mxu1 %v1008_v11 }
 0x278   : > { %v1257_v23 = vpop.f32.mrb[8].mxu0  ;;  %v1298_v24 = vpop.f32.mrb[8].mxu1 }
 0x279   : > { %v1258_v25 = vadd.f32 %v1257_v23, %v1046_v19  ;;  %v1299_v26 = vadd.f32 %v1298_v24, %v1054_v20  ;;  %v1259_v27 = vpop.f32.mrb[9].mxu0  ;;  %v1300_v28 = vpop.f32.mrb[9].mxu1 }
 0x27a   : > { %v1260_v29 = vadd.f32 %v1259_v27, %v1050_v21  ;;  %v1301_v30 = vadd.f32 %v1300_v28, %v1058_v22  ;;  %v1261_v31 = vpop.f32.mrb[10].mxu0  ;;  %v1302_v32 = vpop.f32.mrb[10].mxu1 }
 0x27b   : > { %1305 = vst [vmem:[%s303_s25] sm:$0xff] %v1258_v25  ;;  %1307 = vst [vmem:[%s303_s25 + $0x10] sm:$0xff] %v1299_v26  ;;  %v1262_v33 = vpop.f32.mrb[11].mxu0  ;;  %v1303_v34 = vpop.f32.mrb[11].mxu1 }
 0x27c   : > { %1306 = vst [vmem:[%s303_s25 + $0x8] sm:$0xff] %v1260_v29  ;;  %1308 = vst [vmem:[%s303_s25 + $0x18] sm:$0xff] %v1301_v30 }
 0x27d   : > { %1946 = shalt.err (!%p1943_p8)
}
 0x27e   : > { %s1947_s0 = scalar_lea.hbm %s2309_s6, 512  ;;  %s1951_s16 = scalar_lea.hbm %s2363_s5, 1024 }
 0x27f   : > { %p1948_p12 = scmp.ne.s32.totalorder %s2309_s6, %s1947_s0  ;;  %p1952_p11 = scmp.lt.u32.totalorder %s2309_s6, %s2363_s5 }
 0x280   : > { %p1953_p7 = scmp.lt.u32.totalorder %s1951_s16, %s1947_s0  ;;  %p1955_p0 = scmp.lt.u32.totalorder %s1947_s0, %s2309_s6 }
 0x281   : > { %p1949_p5 = pnand %p1948_p12, %p2386_p6 }
 0x282   : > { %p1954_p1 = por %p1953_p7, %p1952_p11 }
 0x283   : > { %p1950_p10 = pneg %p1949_p5 }
 0x284   : > { %p1956_p2 = por %p1955_p0, %p1954_p1 }
 0x286   : > { %p1957_p3 = pnand %p1956_p2, %p1950_p10 }
 0x288   : > { %1960 = shalt.err (!%p1957_p3)
}
 0x289   : > { %1654 = dma.vmem_to_hbm [thread:$0]  (%p2386_p6), %s2311_s27, 512, %s2309_s6, %s1310_s21  }
 0x28a PF: > { %s1338_s26 = sand.u32 1, %s2003_s18   ;;  %p2387_p9 = scmp.ne.s32.totalorder %s2373_s30, 0 }
 0x28b   : > { %p2388_p13 = scmp.ge.s32.totalorder %s2023_s23, 2  ;;  %s1339_s25 = scalar_lea.sflag [#allocation4], %s1338_s26 }
 0x28d   : > { %p1668_p4 = pnand %p2388_p13, %p2387_p9 }
 0x28f   : > { %1998 = dma.done.wait (!%p1668_p4), %s1339_s25, 512  }
 0x290   : > { %2000 = vsyncadd (!%p1668_p4), %s1339_s25, 4294966784  ;;  %s20_s23 = sadd.s32 1, %s2023_s23   ;;  %s2389_s18 = smov %s2007_s19 }
 0x291   : > { %p17_p8 = scmp.ge.s32.totalorder %s20_s23, 4   ;;  %s2390_s19 = smov %s2011_s20 }
 0x292   : > { %s2391_s20 = smov %s2214_s14  ;;  %s2392_s21 = smov %s2019_s22 }
 0x293   : > { %s2393_s22 = smov %s2395_s17  ;;  %19 = sbr.rel (!%p17_p8) target bundleno = 8 (0x8), region = 96 }
 0x29a   :  { %1344 = vsyncpa [#allocation3], 1 }
 0x29b   :  { %1346 = vsyncpa [#allocation3 + $0x1], 1 }
 0x29c   :  { %1347 = vsyncpa [#allocation6], 1 }
 0x29d   :  { %1348 = vsyncpa [#allocation4], 1 }
 0x29e   :  { %1350 = vsyncpa [#allocation4 + $0x1], 1 }

</bundles_post_ra>
